<compile_context>
chip_gen: v5e
topology: v5e:2x2
jax: 0.10.0
libtpu: 0.0.40
codegen_flags: <defaults>
</compile_context>

<pallas_src>
import functools

import numpy as np
import jax
import jax.numpy as jnp
from jax.experimental import pallas as pl
from jax.experimental.pallas import tpu as pltpu


def _round_up(x, m):
    return ((x + m - 1) // m) * m


def _vmem_capacity_bytes():
    """Physical VMEM of the local chip; conservative (v7x, 64 MiB) fallback."""
    try:
        return int(pltpu.get_tpu_info().vmem_capacity_bytes)
    except Exception:
        return 64 * 1024 * 1024


def _choose_chunking(in_features, out_features):
    """Chunk the flat (out*in) weight axis into groups of whole output rows.

    Returns (rows_per_chunk, chunk_width, num_chunks), chunk_width = rows*in.
    Legality: chunk_width == out*in (single chunk) or a multiple of 128.
    """
    flat = in_features * out_features
    target = 8192                        # ~32 KiB of f32 temp per sublane row
    if flat <= target:
        return out_features, flat, 1
    best = None
    for d in range(1, out_features):
        if (out_features % d == 0 and (d * in_features) % 128 == 0
                and d * in_features <= target):
            best = d
    if best is None:
        # TODO(synk): no lane-legal chunk width divides out*in; fall back to a
        # single full-width chunk (the batch block shrinks to compensate).
        return out_features, flat, 1
    return best, best * in_features, out_features // best


def _choose_blocks(n_rows, in_features, out_features, w_itemsize, out_itemsize):
    """Generation-aware block sizes, consistent with the VMEM limit we request."""
    vmem_cap = _vmem_capacity_bytes()
    big_vmem = vmem_cap >= 100 * 1024 * 1024       # v5e / v6e (128 MiB); v7x has 64
    budget = int(0.55 * vmem_cap)                  # pipeline buffers + in-kernel temps
    vmem_limit = int(0.80 * vmem_cap)              # what we ask Mosaic for
    w_buffers = 3 if big_vmem else 2               # deeper W pipeline when VMEM allows

    rows_per_chunk, chunk_w, num_chunks = _choose_chunking(in_features, out_features)

    in_pad = _round_up(in_features, 128)
    out_pad = _round_up(out_features, 128)
    per_row = (w_buffers * chunk_w * w_itemsize    # W chunk pipeline buffers
               + 3 * chunk_w * 4                   # f32 upcast + x_tiled + product temps
               + 2 * in_pad * 4                    # x block (double buffered)
               + 2 * out_pad * out_itemsize        # out block (double buffered)
               + out_pad * 4)                      # f32 accumulator scratch
    fixed = (2 * in_features * chunk_w * 4         # E selection-matrix buffers
             + 3 * chunk_w * out_pad * 4)          # in-kernel S + iota temporaries

    tb = (budget - fixed) // max(per_row, 1)
    tb = max(8, (tb // 8) * 8)
    tb = min(tb, 1024)                             # diminishing returns past ~1K rows
    if n_rows >= 16:
        # Prefer >= 2 batch blocks so the "parallel" axis can balance v7x's 2 TCs.
        tb = min(tb, _round_up((n_rows + 1) // 2, 8))
    # Never let the block exceed the (>=8 row) array: only the standard masked
    # partial-last-block path is ever used for ragged batches.
    tb = min(tb, (n_rows // 8) * 8)
    tb = max(tb, 8)
    return tb, rows_per_chunk, chunk_w, num_chunks, w_buffers, vmem_limit


def _meta_linear_kernel(x_ref, e_ref, w_ref, o_ref, acc_ref, *,
                        in_features, out_features, num_chunks):
    """One (batch-block, weight-chunk) grid step.

    x_ref: (tb, in)         input rows (resident across chunks)
    e_ref: (in, cw)   f32   0/1 "tile x across the chunk" matrix (fetched once)
    w_ref: (tb, cw)         lane-dense flat weight chunk (whole output rows)
    o_ref: (tb, out)        output rows
    acc_ref: (tb, out) f32  accumulator scratch
    """
    c = pl.program_id(1)
    chunk_w = w_ref.shape[1]

    @pl.when(c == 0)
    def _init():
        acc_ref[...] = jnp.zeros_like(acc_ref)

    x = x_ref[...].astype(jnp.float32)                                   # (tb, in)
    # x_tiled[n, j] = x[n, j % in] — exact 0/1 selection matmul on the idle MXU.
    x_tiled = jnp.dot(x, e_ref[...],
                      precision=jax.lax.Precision.HIGHEST,
                      preferred_element_type=jnp.float32)                # (tb, cw)
    prod = w_ref[...].astype(jnp.float32) * x_tiled                      # VPU (tb, cw)

    # Segment-sum each in-wide lane group into its output column via a 0/1 matmul
    # (keeps the reduce off the XLU cross-lane path).  Built div-free from iotas.
    j = jax.lax.broadcasted_iota(jnp.int32, (chunk_w, out_features), 0) + c * chunk_w
    o = jax.lax.broadcasted_iota(jnp.int32, (chunk_w, out_features), 1)
    lo = o * in_features
    seg = ((j >= lo) & (j < lo + in_features)).astype(jnp.float32)       # (cw, out)
    acc_ref[...] += jnp.dot(prod, seg,
                            precision=jax.lax.Precision.HIGHEST,
                            preferred_element_type=jnp.float32)          # (tb, out)

    @pl.when(c == num_chunks - 1)
    def _finalize():
        o_ref[...] = acc_ref[...].astype(o_ref.dtype)


@functools.partial(jax.jit, static_argnums=(2, 3))
def meta_linear(x, w_flat, in_features, out_features):
    """Pallas MetaLinear.forward: y[n] = w[n].view(out, in) @ x[n].

    Args:
      x:      (N, in_features) input.
      w_flat: (N, out_features * in_features) per-sample dynamic weights, row-major
              over (out, in) exactly like w.view(N, out, in) in the torch module.
              Pass bf16 for ~2x end-to-end speed (the kernel accumulates in f32).
    Returns:
      (N, out_features), dtype = promote_types(x.dtype, w_flat.dtype).
    """
    assert x.ndim == 2 and x.shape[1] == in_features, "x must be (N, in_features)"
    assert w_flat.ndim == 2 and w_flat.shape[0] == x.shape[0], "batch dims must match"
    assert w_flat.shape[1] == out_features * in_features, "w must be (N, out*in)"

    n = x.shape[0]
    flat = out_features * in_features
    out_dtype = jnp.promote_types(x.dtype, w_flat.dtype)

    # Tiny batches only: bring the sublane dim up to one 8-row tile (a few rows,
    # negligible).  Larger ragged batches use Pallas' masked boundary blocks, so
    # W is never copied/padded in HBM.
    n_rows = n
    if n < 8:
        n_rows = 8
        x = jnp.pad(x, ((0, n_rows - n), (0, 0)))
        w_flat = jnp.pad(w_flat, ((0, n_rows - n), (0, 0)))

    tb, _rows_per_chunk, chunk_w, num_chunks, w_buffers, vmem_limit = _choose_blocks(
        n_rows, in_features, out_features,
        jnp.dtype(w_flat.dtype).itemsize, jnp.dtype(out_dtype).itemsize)

    # 0/1 selection matrix E[i, j] = [j % in == i]; chunk-independent because a
    # chunk is a whole number of output rows.  DMA'd into VMEM once (constant
    # block index) and reused for every grid step.
    e = jnp.asarray(
        (np.arange(chunk_w)[None, :] % in_features
         == np.arange(in_features)[:, None]).astype(np.float32))

    grid = (pl.cdiv(n_rows, tb), num_chunks)

    w_spec_kwargs = {}
    if w_buffers != 2:
        # 3-deep W pipeline on 128-MiB-VMEM parts (v5e/v6e); default depth-2 on v7x.
        w_spec_kwargs["pipeline_mode"] = pl.Buffered(w_buffers)

    kernel = functools.partial(
        _meta_linear_kernel,
        in_features=in_features, out_features=out_features, num_chunks=num_chunks)

    cost = pl.CostEstimate(
        flops=2 * n_rows * flat,
        transcendentals=0,
        bytes_accessed=(
            n_rows * flat * jnp.dtype(w_flat.dtype).itemsize
            + n_rows * in_features * jnp.dtype(x.dtype).itemsize
            + n_rows * out_features * jnp.dtype(out_dtype).itemsize
            + e.size * 4),
    )

    out = pl.pallas_call(
        kernel,
        out_shape=jax.ShapeDtypeStruct((n_rows, out_features), out_dtype),
        grid_spec=pltpu.PrefetchScalarGridSpec(
            num_scalar_prefetch=0,
            grid=grid,
            in_specs=[
                pl.BlockSpec((tb, in_features), lambda b, c: (b, 0)),
                pl.BlockSpec((in_features, chunk_w), lambda b, c: (0, 0)),
                pl.BlockSpec((tb, chunk_w), lambda b, c: (b, c), **w_spec_kwargs),
            ],
            out_specs=pl.BlockSpec((tb, out_features), lambda b, c: (b, 0)),
            scratch_shapes=[pltpu.VMEM((tb, out_features), jnp.float32)],
        ),
        compiler_params=pltpu.CompilerParams(
            dimension_semantics=("parallel", "arbitrary"),
            vmem_limit_bytes=vmem_limit,
        ),
        cost_estimate=cost,
    )(x, e, w_flat)
    return out[:n]


if __name__ == "__main__":
    # Module configuration (bias=False default in MetaLinear; forward ignores bias).
    in_features = 32
    out_features = 16
    batch = 2

    key = jax.random.PRNGKey(0)
    kx, kw = jax.random.split(key)
    x = jax.random.normal(kx, (batch, in_features), dtype=jnp.float32)
    # Hypernetwork-style flat per-sample weights, U(-sqrt(k), sqrt(k)), k = 1/in.
    # Emitted in bf16: the kernel is HBM-bound on W, so halving its bytes ~halves
    # wall time on every generation (the kernel still accumulates in f32).
    k = 1.0 / in_features
    w_flat = jax.random.uniform(
        kw, (batch, out_features * in_features),
        minval=-jnp.sqrt(k), maxval=jnp.sqrt(k), dtype=jnp.float32,
    ).astype(jnp.bfloat16)

    y = meta_linear(x, w_flat, in_features, out_features)
    y = jax.block_until_ready(y)

    # Reference: torch.bmm(w.view(N,out,in), x.unsqueeze(-1)).squeeze(-1), computed
    # in f32 on the same bf16 weights the kernel consumed.
    w_ref = w_flat.astype(jnp.float32).reshape(batch, out_features, in_features)
    y_ref = jnp.einsum("noi,ni->no", w_ref, x, precision=jax.lax.Precision.HIGHEST)

    assert y.shape == (batch, out_features)
    assert jnp.allclose(y.astype(jnp.float32), y_ref, atol=1e-5, rtol=1e-5), \
        "mismatch vs reference"
    print("KERNEL_OK")
</pallas_src>

<mosaic_0001>
module attributes {stable_mosaic.version = 11 : i64} {
  func.func @_meta_linear_kernel(%arg0: i32, %arg1: i32, %arg2: memref<8x32xf32, #tpu.memory_space<vmem>>, %arg3: memref<32x512xf32, #tpu.memory_space<vmem>>, %arg4: memref<8x512xbf16, #tpu.memory_space<vmem>>, %arg5: memref<8x16xf32, #tpu.memory_space<vmem>>, %arg6: memref<8x16xf32, #tpu.memory_space<vmem>>) attributes {dimension_semantics = [#tpu.dimension_semantics<parallel>, #tpu.dimension_semantics<arbitrary>], iteration_bounds = array<i64: 1, 1>, scalar_prefetch = 0 : i64, scratch_operands = 1 : i64, tpu.core_type = #tpu.core_type<tc>, window_params = [{transform_indices = @transform_0, window_bounds = array<i64: 8, 32>}, {pipeline_mode = #tpu.pipeline_mode<synchronous>, transform_indices = @transform_1, window_bounds = array<i64: 32, 512>}, {transform_indices = @transform_2, window_bounds = array<i64: 8, 512>}, {transform_indices = @transform_3, window_bounds = array<i64: 8, 16>}]} {
    %c0_i32 = arith.constant 0 : i32
    %0 = arith.cmpi eq, %arg1, %c0_i32 : i32
    %1 = arith.extui %0 : i1 to i32
    %c0_i32_0 = arith.constant 0 : i32
    %2 = arith.cmpi ne, %1, %c0_i32_0 : i32
    scf.if %2 {
      %cst_14 = arith.constant 0.000000e+00 : f32
      %30 = vector.broadcast %cst_14 : f32 to vector<8x16xf32>
      %c0_15 = arith.constant 0 : index
      %c0_16 = arith.constant 0 : index
      %31 = vector.load %arg6[%c0_15, %c0_16] : memref<8x16xf32, #tpu.memory_space<vmem>>, vector<8x16xf32>
      tpu.vector_store %arg6[%c0_15, %c0_16], %30 {strides = array<i32>} : memref<8x16xf32, #tpu.memory_space<vmem>>, vector<8x16xf32>,
    } else {
    }
    %c0 = arith.constant 0 : index
    %c0_1 = arith.constant 0 : index
    %3 = vector.load %arg2[%c0, %c0_1] : memref<8x32xf32, #tpu.memory_space<vmem>>, vector<8x32xf32>
    %c0_2 = arith.constant 0 : index
    %c0_3 = arith.constant 0 : index
    %4 = vector.load %arg3[%c0_2, %c0_3] : memref<32x512xf32, #tpu.memory_space<vmem>>, vector<32x512xf32>
    %cst = arith.constant dense<0.000000e+00> : vector<8x512xf32>
    %5 = tpu.matmul %3, %4, %cst {dimension_numbers = #tpu.dot_dimension_numbers<[1], [0], [0], [1], [0, 0, 1, 1], [], []>, precision = #tpu.contract_precision<fp32>} : vector<8x32xf32>, vector<32x512xf32>, vector<8x512xf32> -> vector<8x512xf32>
    %c0_4 = arith.constant 0 : index
    %c0_5 = arith.constant 0 : index
    %6 = vector.load %arg4[%c0_4, %c0_5] : memref<8x512xbf16, #tpu.memory_space<vmem>>, vector<8x512xbf16>
    %7 = arith.extf %6 : vector<8x512xbf16> to vector<8x512xf32>
    %8 = arith.mulf %7, %5 : vector<8x512xf32>
    %9 = tpu.iota {dimensions = array<i32: 0>} : vector<512x16xi32>
    %c512_i32 = arith.constant 512 : i32
    %10 = arith.muli %arg1, %c512_i32 : i32
    %11 = vector.broadcast %10 : i32 to vector<512x16xi32>
    %12 = arith.addi %9, %11 : vector<512x16xi32>
    %13 = tpu.iota {dimensions = array<i32: 1>} : vector<512x16xi32>
    %c32_i32 = arith.constant 32 : i32
    %14 = vector.broadcast %c32_i32 : i32 to vector<512x16xi32>
    %15 = arith.muli %13, %14 : vector<512x16xi32>
    %16 = arith.cmpi sge, %12, %15 : vector<512x16xi32>
    %c32_i32_6 = arith.constant 32 : i32
    %17 = vector.broadcast %c32_i32_6 : i32 to vector<512x16xi32>
    %18 = arith.addi %15, %17 : vector<512x16xi32>
    %19 = arith.cmpi slt, %12, %18 : vector<512x16xi32>
    %20 = arith.andi %16, %19 : vector<512x16xi1>
    %21 = arith.extui %20 : vector<512x16xi1> to vector<512x16xi32>
    %22 = arith.sitofp %21 : vector<512x16xi32> to vector<512x16xf32>
    %c0_7 = arith.constant 0 : index
    %c0_8 = arith.constant 0 : index
    %23 = vector.load %arg6[%c0_7, %c0_8] : memref<8x16xf32, #tpu.memory_space<vmem>>, vector<8x16xf32>
    %cst_9 = arith.constant dense<0.000000e+00> : vector<8x16xf32>
    %24 = tpu.matmul %8, %22, %cst_9 {dimension_numbers = #tpu.dot_dimension_numbers<[1], [0], [0], [1], [0, 0, 1, 1], [], []>, precision = #tpu.contract_precision<fp32>} : vector<8x512xf32>, vector<512x16xf32>, vector<8x16xf32> -> vector<8x16xf32>
    %25 = arith.addf %23, %24 : vector<8x16xf32>
    %c0_10 = arith.constant 0 : index
    %c0_11 = arith.constant 0 : index
    %26 = vector.load %arg6[%c0_10, %c0_11] : memref<8x16xf32, #tpu.memory_space<vmem>>, vector<8x16xf32>
    tpu.vector_store %arg6[%c0_10, %c0_11], %25 {strides = array<i32>} : memref<8x16xf32, #tpu.memory_space<vmem>>, vector<8x16xf32>,
    %c0_i32_12 = arith.constant 0 : i32
    %27 = arith.cmpi eq, %arg1, %c0_i32_12 : i32
    %28 = arith.extui %27 : i1 to i32
    %c0_i32_13 = arith.constant 0 : i32
    %29 = arith.cmpi ne, %28, %c0_i32_13 : i32
    scf.if %29 {
      %c0_14 = arith.constant 0 : index
      %c0_15 = arith.constant 0 : index
      %30 = vector.load %arg6[%c0_14, %c0_15] : memref<8x16xf32, #tpu.memory_space<vmem>>, vector<8x16xf32>
      %c0_16 = arith.constant 0 : index
      %c0_17 = arith.constant 0 : index
      %31 = vector.load %arg5[%c0_16, %c0_17] : memref<8x16xf32, #tpu.memory_space<vmem>>, vector<8x16xf32>
      tpu.vector_store %arg5[%c0_16, %c0_17], %30 {strides = array<i32>} : memref<8x16xf32, #tpu.memory_space<vmem>>, vector<8x16xf32>,
    } else {
    }
    return
  }
  func.func @transform_0(%arg0: i32, %arg1: i32) -> (i32, i32) {
    %c0_i32 = arith.constant 0 : i32
    %c0_i32_0 = arith.constant 0 : i32
    return %arg0, %c0_i32 : i32, i32
  }
  func.func @transform_1(%arg0: i32, %arg1: i32) -> (i32, i32) {
    %c0_i32 = arith.constant 0 : i32
    %c0_i32_0 = arith.constant 0 : i32
    %c0_i32_1 = arith.constant 0 : i32
    return %c0_i32, %c0_i32_0 : i32, i32
  }
  func.func @transform_2(%arg0: i32, %arg1: i32) -> (i32, i32) {
    %c0_i32 = arith.constant 0 : i32
    return %arg0, %arg1 : i32, i32
  }
  func.func @transform_3(%arg0: i32, %arg1: i32) -> (i32, i32) {
    %c0_i32 = arith.constant 0 : i32
    %c0_i32_0 = arith.constant 0 : i32
    return %arg0, %c0_i32 : i32, i32
  }
}

</mosaic_0001>

<bundles_post_ra>
// kernel: meta_linear.1
= control target key start
LH: loop header
LB: loop body
LE: loop exit
PB: predicated region body
PF: predicated region fallthrough
CT: control target
= control target key end

     0   :  { %8 = vsyncpa [#allocation4], 0  ;;  %s2927_s15 = smov [#allocation3]   ;;  %s2928_s17 = smov 512   ;;  %s5266_s0 = inlined_call_operand.vmem [shape: f32[8,32], index: 0, kind: input, shape index: {}]   ;;  %s5267_s1 = inlined_call_operand.hbm [shape: f32[32,512], index: 1, kind: input, shape index: {}]   ;;  %s5268_s2 = inlined_call_operand.vmem [shape: bf16[8,512], index: 2, kind: input, shape index: {}]   ;;  %s5269_s3 = inlined_call_operand.vmem [shape: f32[8,16], index: 3, kind: output, shape index: {}]  }
   0x1   :  { %s15_s14 = sshll.u32 %s5267_s1, 4  ;;  %s17_s16 = sshll.u32 %s2927_s15, 4  ;;  %s16_s14 = int_to_ptr.hbm [resolvable:$true] %s15_s14  ;;  %s18_s16 = int_to_ptr.vmem [resolvable:$true] %s17_s16 }
   0x2   :  { %s2929_s18 = smov 32  }
   0x3   :  { %23 = dma.hbm_to_vmem [thread:$0]  %s16_s14, 2048, %s18_s16, [#allocation4], %s2928_s17, %s2928_s17, %s2929_s18  }
   0x4   :  { %2925 = dma.done.wait [#allocation4], 2048  }
   0x5   :  { %2926 = vsyncadd [#allocation4], 4294965248  ;;  %vm53_vm0 = vcmask 261120   ;;  %v49_v0 = vld [vmem:[#allocation3 + $0x60] sm:$0xff]  ;;  %v36_v7 = vld [vmem:[%s5266_s0] sm:$0xff] }
   0x6   :  { %v45_v1 = vld [vmem:[#allocation3 + $0x40] sm:$0xff]  ;;  %v2955_v3 = vand.u32 4294901760, %v49_v0  ;;  %v50_v8 = vld [vmem:[#allocation3 + $0x68] sm:$0xff]  ;;  %v55_v10 = vsel %vm53_vm0, %v36_v7, 0  ;;  %v51_v52 = vld [vmem:[#allocation3 + $0x70] sm:$0xff] }
   0x7   :  { %v41_v2 = vld [vmem:[#allocation3 + $0x20] sm:$0xff]  ;;  %v2957_v4 = vand.u32 4294901760, %v45_v1  ;;  %v2966_v11 = vand.u32 4294901760, %v50_v8  ;;  %v46_v12 = vld [vmem:[#allocation3 + $0x48] sm:$0xff]  ;;  %v2975_v17 = vand.u32 4294901760, %v55_v10  ;;  %v47_v55 = vld [vmem:[#allocation3 + $0x50] sm:$0xff] }
   0x8   :  { %v2959_v5 = vand.u32 4294901760, %v41_v2  ;;  %v37_v6 = vld [vmem:[#allocation3] sm:$0xff]  ;;  %v42_v13 = vld [vmem:[#allocation3 + $0x28] sm:$0xff]  ;;  %v99_v14 = vsub.f32 %v49_v0, %v2955_v3  ;;  %70 = vmatpush.msra.mxu0 %v2955_v3  ;;  %170 = vmatpush.msra.mxu3 %v2955_v3  ;;  %v2980_v20 = vand.u32 4294901760, %v46_v12  ;;  %v3036_v56 = vand.u32 4294901760, %v51_v52  ;;  %v43_v59 = vld [vmem:[#allocation3 + $0x30] sm:$0xff] }
   0x9   :  { %v2964_v9 = vand.u32 4294901760, %v37_v6  ;;  %v105_v15 = vsub.f32 %v45_v1, %v2957_v4  ;;  %v38_v18 = vld [vmem:[#allocation3 + $0x8] sm:$0xff]  ;;  %v2983_v21 = vsub.f32 %v50_v8, %v2966_v11  ;;  %v2985_v22 = vand.u32 4294901760, %v42_v13  ;;  %v39_v60 = vld [vmem:[#allocation3 + $0x10] sm:$0xff]  ;;  %v52_v1 = vld [vmem:[#allocation3 + $0x78] sm:$0xff] }
   0xa   :  { %v2973_v16 = vsub.f32 %v41_v2, %v2959_v5  ;;  %141 = vmatpush.msra.mxu2 %v99_v14  ;;  %72 = vmatpush.msra.mxu0 %v2957_v4  ;;  %v100_v23 = vand.u32 4294901760, %v99_v14  ;;  %v2989_v25 = vsub.f32 %v55_v10, %v2975_v17  ;;  %v2996_v29 = vsub.f32 %v46_v12, %v2980_v20 }
   0xb   :  { %v2978_v19 = vsub.f32 %v37_v6, %v2964_v9  ;;  %v106_v24 = vand.u32 4294901760, %v105_v15  ;;  %172 = vmatpush.msra.mxu3 %v2957_v4  ;;  %v285_v28 = vand.u32 4294901760, %v2983_v21  ;;  %v2998_v30 = vand.u32 4294901760, %v38_v18 }
   0xc   :  { %v112_v26 = vand.u32 4294901760, %v2973_v16  ;;  %144 = vmatpush.msra.mxu2 %v105_v15  ;;  %v101_v31 = vsub.f32 %v99_v14, %v100_v23  ;;  %74 = vmatpush.msra.mxu0 %v2959_v5  ;;  %v3003_v34 = vand.u32 4294901760, %v2989_v25  ;;  %v291_v36 = vand.u32 4294901760, %v2996_v29 }
   0xd   :  { %v118_v27 = vand.u32 4294901760, %v2978_v19  ;;  %v107_v32 = vsub.f32 %v105_v15, %v106_v24  ;;  %174 = vmatpush.msra.mxu3 %v2959_v5  ;;  %v286_v35 = vsub.f32 %v2983_v21, %v285_v28  ;;  %v3011_v37 = vsub.f32 %v42_v13, %v2985_v22 }
   0xe   :  { %v113_v33 = vsub.f32 %v2973_v16, %v112_v26  ;;  %v102_v38 = vand.u32 4294901760, %v101_v31  ;;  %147 = vmatpush.msra.mxu2 %v2973_v16  ;;  %76 = vmatpush.msra.mxu0 %v2964_v9  ;;  %v80_v40 = vsub.f32 %v2989_v25, %v3003_v34  ;;  %v292_v43 = vsub.f32 %v2996_v29, %v291_v36 }
   0xf   :  { %v108_v39 = vand.u32 4294901760, %v107_v32  ;;  %v119_v41 = vsub.f32 %v2978_v19, %v118_v27  ;;  %176 = vmatpush.msra.mxu3 %v2964_v9  ;;  %v287_v42 = vand.u32 4294901760, %v286_v35  ;;  %v297_v44 = vand.u32 4294901760, %v3011_v37 }
  0x10   :  { %199 = vmatpush.msrb.mxu0 %v100_v23  ;;  %103 = vmatpush.msra.mxu1 %v102_v38  ;;  %v114_v45 = vand.u32 4294901760, %v113_v33  ;;  %v3022_v46 = vand.u32 4294901760, %v80_v40  ;;  %v3025_v47 = vsub.f32 %v38_v18, %v2998_v30  ;;  %v293_v48 = vand.u32 4294901760, %v292_v43 }
  0x11   :  { %150 = vmatpush.msra.mxu2 %v2978_v19  ;;  %180 = vmatmul.f32.vlgmr.msra.gmra.mxu3 %v3003_v34  ;;  %v298_v49 = vsub.f32 %v3011_v37, %v297_v44  ;;  %v120_v50 = vand.u32 4294901760, %v119_v41  ;;  %v3041_v58 = vand.u32 4294901760, %v47_v55  ;;  %v3046_v61 = vsub.f32 %v51_v52, %v3036_v56  ;;  %v40_v19 = vld [vmem:[#allocation3 + $0x18] sm:$0xff] }
  0x12   :  { %153 = vmatmul.f32.vlgmr.msra.gmra.mxu2 %v2989_v25  ;;  %109 = vmatpush.msra.mxu1 %v108_v39  ;;  %v303_v51 = vand.u32 4294901760, %v3025_v47  ;;  %v3050_v62 = vand.u32 4294901760, %v43_v59  ;;  %v3057_v0 = vand.u32 4294901760, %v39_v60  ;;  %v3074_v7 = vand.u32 4294901760, %v52_v1 }
  0x13   :  { %255 = vmatpush.msrb.mxu2 %v2966_v11  ;;  %82 = vmatmul.f32.vlgmr.msra.gmra.mxu0 %v3022_v46  ;;  %v299_v54 = vand.u32 4294901760, %v298_v49  ;;  %v3055_v63 = vsub.f32 %v47_v55, %v3041_v58  ;;  %v470_v2 = vand.u32 4294901760, %v3046_v61  ;;  %v5392_v52 = vmov 0 }
  0x14   :  { %288 = vmatpush.msrb.mxu3 %v287_v42  ;;  %115 = vmatpush.msra.mxu1 %v114_v45  ;;  %v304_v53 = vsub.f32 %v3025_v47, %v303_v51  ;;  %v3072_v6 = vsub.f32 %v39_v60, %v3057_v0  ;;  %v3095_v18 = vsub.f32 %v52_v1, %v3074_v7  ;;  %v5394_v60 = vmov 0 }
  0x15   :  { %257 = vmatpush.msrb.mxu2 %v2980_v20  ;;  %203 = vmatpush.msrb.mxu0 %v106_v24  ;;  %v471_v10 = vsub.f32 %v3046_v61, %v470_v2 }
  0x16   :  { %294 = vmatpush.msrb.mxu3 %v293_v48  ;;  %121 = vmatpush.msra.mxu1 %v120_v50  ;;  %v305_v57 = vand.u32 4294901760, %v304_v53  ;;  %v488_v16 = vand.u32 4294901760, %v3072_v6  ;;  %v655_v32 = vand.u32 4294901760, %v3095_v18  ;;  %v5365_v48 = vmov 0.0  }
  0x17   :  { %259 = vmatpush.msrb.mxu2 %v2985_v22  ;;  %123 = vmatmul.f32.vlgmr.msra.gmra.mxu1 %v2975_v17 }
  0x18   :  { %207 = vmatpush.msrb.mxu0 %v112_v26  ;;  %230 = vmatpush.msrb.mxu1 %v2955_v3  ;;  %v48_v3 = vld [vmem:[#allocation3 + $0x58] sm:$0xff]  ;;  %v472_v26 = vand.u32 4294901760, %v471_v10  ;;  %v489_v33 = vsub.f32 %v3072_v6, %v488_v16  ;;  %v656_v41 = vsub.f32 %v3095_v18, %v655_v32 }
  0x19   :  { %261 = vmatpush.msrb.mxu2 %v2998_v30  ;;  %300 = vmatpush.msrb.mxu3 %v299_v54  ;;  %v3077_v8 = vand.u32 4294901760, %v48_v3 }
  0x1a   :  { %267 = vmatmul.f32.vlgmr.msrb.gmra.mxu2 %v3022_v46  ;;  %232 = vmatpush.msrb.mxu1 %v2957_v4  ;;  %v3066_v4 = vsub.f32 %v43_v59, %v3050_v62  ;;  %v490_v43 = vand.u32 4294901760, %v489_v33  ;;  %v657_v53 = vand.u32 4294901760, %v656_v41 }
  0x1b   :  { %211 = vmatpush.msrb.mxu0 %v118_v27  ;;  %306 = vmatpush.msrb.mxu3 %v305_v57 }
  0x1c   :  { %384 = vmatpush.msra.mxu2 %v285_v28  ;;  %234 = vmatpush.msrb.mxu1 %v2959_v5  ;;  %v476_v5 = vand.u32 4294901760, %v3055_v63  ;;  %v482_v12 = vand.u32 4294901760, %v3066_v4  ;;  %v3115_v28 = vand.u32 4294901760, %v40_v19 }
  0x1d   :  { %213 = vmatmul.f32.vlgmr.msrb.gmra.mxu0 %v2975_v17  ;;  %308 = vmatmul.f32.vlgmr.msrb.gmra.mxu3 %v2975_v17 }
  0x1e   :  { %326 = vmatpush.msra.mxu0 %v2983_v21  ;;  %236 = vmatpush.msrb.mxu1 %v2964_v9  ;;  %v807_v9 = vlaneseq  ;;  %v477_v15 = vsub.f32 %v3055_v63, %v476_v5  ;;  %v3102_v21 = vsub.f32 %v48_v3, %v3077_v8  ;;  %v3142_v39 = vsub.f32 %v40_v19, %v3115_v28 }
  0x1f   :  { %388 = vmatpush.msra.mxu2 %v291_v36  ;;  %415 = vmatpush.msra.mxu3 %v2966_v11 }
  0x20   :  { %238 = vmatmul.f32.vlgmr.msrb.gmra.mxu1 %v2975_v17  ;;  %329 = vmatpush.msra.mxu0 %v2996_v29  ;;  %v3086_v13 = vshrl.u32 %v807_v9, 7  ;;  %v939_v14 = vand.u32 127, %v807_v9  ;;  %v478_v31 = vand.u32 4294901760, %v477_v15  ;;  %v661_v35 = vand.u32 4294901760, %v3102_v21 }
  0x21   :  { %355 = vmatpush.msra.mxu1 %v2966_v11  ;;  %392 = vmatpush.msra.mxu2 %v297_v44  ;;  %v44_v11 = vld [vmem:[#allocation3 + $0x38] sm:$0xff]  ;;  %v5396_v9 = vmov 0 }
  0x22   :  { %417 = vmatpush.msra.mxu3 %v2980_v20  ;;  %332 = vmatpush.msra.mxu0 %v3011_v37  ;;  %v823_v23 = vadd.s32 120, %v3086_v13  ;;  %v3105_v24 = vmul.u32 32, %v939_v14  ;;  %v822_v27 = vadd.s32 112, %v3086_v13  ;;  %v820_v37 = vadd.s32 96, %v3086_v13 }
  0x23   :  { %357 = vmatpush.msra.mxu1 %v2980_v20  ;;  %396 = vmatpush.msra.mxu2 %v303_v51  ;;  %v3099_v20 = vand.u32 4294901760, %v44_v11  ;;  %v819_v42 = vadd.s32 88, %v3086_v13  ;;  %v662_v44 = vsub.f32 %v3102_v21, %v661_v35  ;;  %v818_v50 = vadd.s32 80, %v3086_v13 }
  0x24   :  { %419 = vmatpush.msra.mxu3 %v2985_v22  ;;  %398 = vmatmul.f32.vlgmr.msra.gmra.mxu2 %v2975_v17  ;;  %v3118_v29 = vadd.s32 32, %v3105_v24  ;;  %vm956_vm1 = vcmp.ge.s32.totalorder %v823_v23, %v3105_v24  ;;  %vm955_vm3 = vcmp.ge.s32.totalorder %v822_v27, %v3105_v24  ;;  %vm953_vm9 = vcmp.ge.s32.totalorder %v820_v37, %v3105_v24 }
  0x25   :  { %335 = vmatpush.msra.mxu0 %v3025_v47  ;;  %359 = vmatpush.msra.mxu1 %v2985_v22  ;;  %v483_v22 = vsub.f32 %v3066_v4, %v482_v12  ;;  %v3132_v36 = vsub.f32 %v44_v11, %v3099_v20  ;;  %v673_v51 = vand.u32 4294901760, %v3142_v39  ;;  %vm952_vm12 = vcmp.ge.s32.totalorder %v819_v42, %v3105_v24 }
  0x26   :  { %421 = vmatpush.msra.mxu3 %v2998_v30  ;;  %338 = vmatmul.f32.vlgmr.msra.gmra.mxu0 %v2989_v25  ;;  %vm1021_vm2 = vcmp.lt.s32.totalorder %v823_v23, %v3118_v29  ;;  %vm1020_vm4 = vcmp.lt.s32.totalorder %v822_v27, %v3118_v29  ;;  %vm1018_vm10 = vcmp.lt.s32.totalorder %v820_v37, %v3118_v29  ;;  %v663_v55 = vand.u32 4294901760, %v662_v44 }
  0x27   :  { %423 = vmatmul.f32.vlgmr.msra.gmra.mxu3 %v2975_v17  ;;  %361 = vmatpush.msra.mxu1 %v2998_v30  ;;  %v821_v30 = vadd.s32 104, %v3086_v13  ;;  %v484_v38 = vand.u32 4294901760, %v483_v22  ;;  %vm3146_vm5 = vmand %vm956_vm1, %vm1021_vm2  ;;  %v667_v45 = vand.u32 4294901760, %v3132_v36  ;;  %vm1017_vm13 = vcmp.lt.s32.totalorder %v819_v42, %v3118_v29 }
  0x28   :  { %511 = vmatpush.msrb.mxu2 %v3046_v61  ;;  %365 = vmatmul.f32.vlgmr.msra.gmra.mxu1 %v3003_v34  ;;  %vm3167_vm8 = vmand %vm955_vm3, %vm1020_vm4  ;;  %v2655_v49 = vsel %vm3146_vm5, 1.0, %v5365_v48  ;;  %vm951_vm15 = vcmp.ge.s32.totalorder %v818_v50, %v3105_v24  ;;  %vm1016_vm0 = vcmp.lt.s32.totalorder %v818_v50, %v3118_v29  ;;  %v817_v1 = vadd.s32 72, %v3086_v13 }
  0x29   :  { %440 = vmatpush.msrb.mxu0 %v3036_v56  ;;  %540 = vmatpush.msrb.mxu3 %v3036_v56  ;;  %vm954_vm6 = vcmp.ge.s32.totalorder %v821_v30, %v3105_v24  ;;  %vm1019_vm7 = vcmp.lt.s32.totalorder %v821_v30, %v3118_v29  ;;  %v2654_v54 = vsel %vm3167_vm8, 1.0, %v5365_v48  ;;  %v668_v57 = vsub.f32 %v3132_v36, %v667_v45  ;;  %vm3207_vm14 = vmand %vm953_vm9, %vm1018_vm10 }
  0x2a   :  { %514 = vmatpush.msrb.mxu2 %v3055_v63  ;;  %473 = vmatpush.msrb.mxu1 %v472_v26  ;;  %vm3185_vm11 = vmand %vm954_vm6, %vm1019_vm7  ;;  %v3201_v59 = vsub.f32 %v2655_v49, %v2655_v49  ;;  %v5395_v60 = vsel %vm3207_vm14, 4294967295, %v5394_v60  ;;  %v3225_v3 = vsub.f32 %v2654_v54, %v2654_v54  ;;  %v816_v63 = vadd.s32 64, %v3086_v13 }
  0x2b   :  { %442 = vmatpush.msrb.mxu0 %v3041_v58  ;;  %542 = vmatpush.msrb.mxu3 %v3041_v58  ;;  %v5393_v52 = vsel %vm3185_vm11, 4294967295, %v5392_v52  ;;  %v2653_v61 = vsel %vm3185_vm11, 1.0, %v5365_v48  ;;  %vm3231_vm1 = vmand %vm952_vm12, %vm1017_vm13  ;;  %v5398_v14 = vmov 0  ;;  %vm950_vm3 = vcmp.ge.s32.totalorder %v817_v1, %v3105_v24 }
  0x2c   :  { %517 = vmatpush.msrb.mxu2 %v3066_v4  ;;  %479 = vmatpush.msrb.mxu1 %v478_v31  ;;  %v5397_v9 = vsel %vm3231_vm1, 4294967295, %v5396_v9  ;;  %v1306_v10 = vand.u32 4294901760, %v3201_v59  ;;  %v3244_v11 = vsub.f32 %v2653_v61, %v2653_v61  ;;  %vm3250_vm2 = vmand %vm951_vm15, %vm1016_vm0  ;;  %vm1015_vm4 = vcmp.lt.s32.totalorder %v817_v1, %v3118_v29 }
  0x2d   :  { %444 = vmatpush.msrb.mxu0 %v3050_v62  ;;  %544 = vmatpush.msrb.mxu3 %v3050_v62  ;;  %v5399_v14 = vsel %vm3250_vm2, 4294967295, %v5398_v14  ;;  %v815_v4 = vadd.s32 56, %v3086_v13  ;;  %v1312_v15 = vand.u32 4294901760, %v3225_v3  ;;  %v2650_v23 = vsel %vm3250_vm2, 1.0, %v5365_v48  ;;  %vm3283_vm9 = vmand %vm950_vm3, %vm1015_vm4 }
  0x2e   :  { %520 = vmatpush.msrb.mxu2 %v3072_v6  ;;  %485 = vmatpush.msrb.mxu1 %v484_v38  ;;  %vm949_vm6 = vcmp.ge.s32.totalorder %v816_v63, %v3105_v24  ;;  %vm1014_vm7 = vcmp.lt.s32.totalorder %v816_v63, %v3118_v29  ;;  %v814_v6 = vadd.s32 48, %v3086_v13  ;;  %v813_v27 = vadd.s32 40, %v3086_v13 }
  0x2f   :  { %523 = vmatmul.f32.vlgmr.msrb.gmra.mxu2 %v2989_v25  ;;  %446 = vmatpush.msrb.mxu0 %v3057_v0  ;;  %vm948_vm10 = vcmp.ge.s32.totalorder %v815_v4, %v3105_v24  ;;  %vm1013_vm12 = vcmp.lt.s32.totalorder %v815_v4, %v3118_v29  ;;  %v1313_v22 = vsub.f32 %v3225_v3, %v1312_v15  ;;  %vm3306_vm13 = vmand %vm949_vm6, %vm1014_vm7  ;;  %v812_v30 = vadd.s32 32, %v3086_v13 }
  0x30   :  { %546 = vmatpush.msrb.mxu3 %v3057_v0  ;;  %452 = vmatmul.f32.vlgmr.msrb.gmra.mxu0 %v3022_v46  ;;  %v3300_v31 = vsub.f32 %v2650_v23, %v2650_v23  ;;  %v2649_v37 = vsel %vm3283_vm9, 1.0, %v5365_v48  ;;  %vm947_vm15 = vcmp.ge.s32.totalorder %v814_v6, %v3105_v24  ;;  %vm1012_vm0 = vcmp.lt.s32.totalorder %v814_v6, %v3118_v29  ;;  %vm3330_vm3 = vmand %vm948_vm10, %vm1013_vm12 }
  0x31   :  { %550 = vmatmul.f32.vlgmr.msrb.gmra.mxu3 %v3003_v34  ;;  %491 = vmatpush.msrb.mxu1 %v490_v43  ;;  %vm946_vm4 = vcmp.ge.s32.totalorder %v813_v27, %v3105_v24  ;;  %vm1011_vm6 = vcmp.lt.s32.totalorder %v813_v27, %v3118_v29  ;;  %v2648_v41 = vsel %vm3306_vm13, 1.0, %v5365_v48  ;;  %v811_v42 = vadd.s32 24, %v3086_v13  ;;  %vm3352_vm7 = vmand %vm947_vm15, %vm1012_vm0 }
  0x32   :  { %569 = vmatpush.msra.mxu0 %v470_v2  ;;  %493 = vmatmul.f32.vlgmr.msrb.gmra.mxu1 %v2975_v17  ;;  %v674_v2 = vsub.f32 %v3142_v39, %v673_v51  ;;  %v1336_v43 = vand.u32 4294901760, %v3300_v31  ;;  %v3346_v44 = vsub.f32 %v2649_v37, %v2649_v37  ;;  %vm945_vm10 = vcmp.ge.s32.totalorder %v812_v30, %v3105_v24  ;;  %vm3371_vm15 = vmand %vm946_vm4, %vm1011_vm6 }
  0x33   :  { %625 = vmatpush.msra.mxu2 %v3074_v7  ;;  %600 = vmatpush.msra.mxu1 %v3036_v56  ;;  %v2652_v56 = vsel %vm3207_vm14, 1.0, %v5365_v48  ;;  %vm1010_vm12 = vcmp.lt.s32.totalorder %v812_v30, %v3118_v29  ;;  %v2647_v49 = vsel %vm3330_vm3, 1.0, %v5365_v48  ;;  %v5408_v50 = vmov 0 }
  0x34   :  { %573 = vmatpush.msra.mxu0 %v476_v5  ;;  %658 = vmatpush.msra.mxu3 %v657_v53  ;;  %v669_v5 = vand.u32 4294901760, %v668_v57  ;;  %v3265_v19 = vsub.f32 %v2652_v56, %v2652_v56  ;;  %v5409_v50 = vsel %vm3371_vm15, 4294967295, %v5408_v50  ;;  %v3381_v54 = vsub.f32 %v2648_v41, %v2648_v41  ;;  %vm3391_vm0 = vmand %vm945_vm10, %vm1010_vm12 }
  0x35   :  { %627 = vmatpush.msra.mxu2 %v3077_v8  ;;  %602 = vmatpush.msra.mxu1 %v3041_v58  ;;  %v2651_v58 = vsel %vm3231_vm1, 1.0, %v5365_v48  ;;  %v5410_v57 = vmov 0  ;;  %vm944_vm4 = vcmp.ge.s32.totalorder %v811_v42, %v3105_v24  ;;  %vm1009_vm6 = vcmp.lt.s32.totalorder %v811_v42, %v3118_v29 }
  0x36   :  { %577 = vmatpush.msra.mxu0 %v482_v12  ;;  %664 = vmatpush.msra.mxu3 %v663_v55  ;;  %v675_v12 = vand.u32 4294901760, %v674_v2  ;;  %v1324_v33 = vand.u32 4294901760, %v3265_v19  ;;  %v2646_v55 = vsel %vm3352_vm7, 1.0, %v5365_v48  ;;  %v5411_v57 = vsel %vm3391_vm0, 4294967295, %v5410_v57  ;;  %vm3426_vm10 = vmand %vm944_vm4, %vm1009_vm6 }
  0x37   :  { %629 = vmatpush.msra.mxu2 %v3099_v20  ;;  %604 = vmatpush.msra.mxu1 %v3050_v62  ;;  %v1318_v62 = vand.u32 4294901760, %v3244_v11  ;;  %v809_v61 = vadd.s32 8, %v3086_v13  ;;  %v1337_v1 = vsub.f32 %v3300_v31, %v1336_v43  ;;  %v1342_v2 = vand.u32 4294901760, %v3346_v44 }
  0x38   :  { %581 = vmatpush.msra.mxu0 %v488_v16  ;;  %670 = vmatpush.msra.mxu3 %v669_v5  ;;  %v3277_v16 = vsub.f32 %v2651_v58, %v2651_v58  ;;  %v3404_v56 = vsub.f32 %v2647_v49, %v2647_v49  ;;  %v2645_v63 = vsel %vm3371_vm15, 1.0, %v5365_v48  ;;  %v3417_v58 = vsub.f32 %v2646_v55, %v2646_v55 }
  0x39   :  { %583 = vmatmul.f32.vlgmr.msra.gmra.mxu0 %v2975_v17  ;;  %631 = vmatpush.msra.mxu2 %v3115_v28  ;;  %v2644_v4 = vsel %vm3391_vm0, 1.0, %v5365_v48  ;;  %v3431_v23 = vsub.f32 %v2645_v63, %v2645_v63  ;;  %v1338_v6 = vand.u32 4294901760, %v1337_v1  ;;  %v1343_v27 = vsub.f32 %v3346_v44, %v1342_v2 }
  0x3a   :  { %606 = vmatpush.msra.mxu1 %v3057_v0  ;;  %v1307_v0 = vsub.f32 %v3201_v59, %v1306_v10  ;;  %676 = vmatpush.msra.mxu3 %v675_v12  ;;  %v3452_v30 = vsub.f32 %v2644_v4, %v2644_v4  ;;  %vm1006_vm0 = vcmp.lt.s32.totalorder %v3086_v13, %v3118_v29 }
  0x3b   :  { %608 = vmatmul.f32.vlgmr.msra.gmra.mxu1 %v2975_v17  ;;  %754 = vmatpush.msrb.mxu2 %v655_v32  ;;  %v5285_v41 = vand.u32 4294901760, %v3431_v23 }
  0x3c   :  { %725 = vmatpush.msrb.mxu1 %v3074_v7  ;;  %785 = vmatpush.msrb.mxu3 %v3074_v7  ;;  %v1330_v7 = vand.u32 4294901760, %v3277_v16 }
  0x3d   :  { %758 = vmatpush.msrb.mxu2 %v661_v35  ;;  %v1319_v35 = vsub.f32 %v3244_v11, %v1318_v62  ;;  %696 = vmatpush.msrb.mxu0 %v3095_v18  ;;  %v1314_v18 = vand.u32 4294901760, %v1313_v22  ;;  %v1367_v63 = vsub.f32 %v3431_v23, %v5285_v41 }
  0x3e   :  { %727 = vmatpush.msrb.mxu1 %v3077_v8  ;;  %637 = vmatmul.f32.vlgmr.msra.gmra.mxu2 %v3022_v46  ;;  %v1308_v46 = vand.u32 4294901760, %v1307_v0  ;;  %v1331_v53 = vsub.f32 %v3277_v16, %v1330_v7  ;;  %v1354_v0 = vand.u32 4294901760, %v3404_v56 }
  0x3f   :  { %762 = vmatpush.msrb.mxu2 %v667_v45  ;;  %787 = vmatpush.msrb.mxu3 %v3077_v8  ;;  %v1325_v45 = vsub.f32 %v3265_v19, %v1324_v33 }
  0x40   :  { %729 = vmatpush.msrb.mxu1 %v3099_v20  ;;  %678 = vmatmul.f32.vlgmr.msra.gmra.mxu3 %v2975_v17  ;;  %v1355_v49 = vsub.f32 %v3404_v56, %v1354_v0 }
  0x41   :  { %766 = vmatpush.msrb.mxu2 %v673_v51  ;;  %789 = vmatpush.msrb.mxu3 %v3099_v20  ;;  %v810_v51 = vadd.s32 16, %v3086_v13  ;;  %v1320_v20 = vand.u32 4294901760, %v1319_v35  ;;  %v1326_v5 = vand.u32 4294901760, %v1325_v45  ;;  %v5288_v35 = vand.u32 4294901760, %v3417_v58 }
  0x42   :  { %731 = vmatpush.msrb.mxu1 %v3115_v28  ;;  %699 = vmatpush.msrb.mxu0 %v3102_v21  ;;  %v5356_v21 = vmov 1.0   ;;  %v1344_v45 = vand.u32 4294901760, %v1343_v27 }
  0x43   :  { %1407 = vmatpush.msra.mxu2 %v3201_v59  ;;  %791 = vmatpush.msrb.mxu3 %v3115_v28  ;;  %v1348_v28 = vand.u32 4294901760, %v3381_v54  ;;  %vm5414_vm4 = vcmp.lt.s32.totalorder %v810_v51, %v3118_v29  ;;  %vm5415_vm6 = vcmp.ge.s32.totalorder %v810_v51, %v3105_v24  ;;  %v831_v59 = vadd.s32 184, %v3086_v13 }
  0x44   :  { %1309 = vmatpush.msra.mxu1 %v1308_v46  ;;  %702 = vmatpush.msrb.mxu0 %v3132_v36  ;;  %v1332_v36 = vand.u32 4294901760, %v1331_v53  ;;  %vm3447_vm12 = vmand %vm5415_vm6, %vm5414_vm4  ;;  %vm5418_vm4 = vcmp.lt.s32.totalorder %v809_v61, %v3118_v29  ;;  %vm5419_vm6 = vcmp.ge.s32.totalorder %v809_v61, %v3105_v24  ;;  %v838_v53 = vadd.s32 240, %v3086_v13 }
  0x45   :  { %1410 = vmatpush.msra.mxu2 %v3225_v3  ;;  %2720 = vmatpush.msk.msra.mxu3 %vm3146_vm5, %v5356_v21  ;;  %v1349_v37 = vsub.f32 %v3381_v54, %v1348_v28  ;;  %vm3473_vm15 = vmand %vm5419_vm6, %vm5418_vm4  ;;  %v2642_v42 = vsel %vm3447_vm12, 1.0, %v5365_v48  ;;  %vm5422_vm4 = vcmp.ge.s32.totalorder %v3086_v13, %v3105_v24  ;;  %v1361_v61 = vsub.f32 %v3417_v58, %v5288_v35 }
  0x46   :  { %1315 = vmatpush.msra.mxu1 %v1314_v18  ;;  %705 = vmatpush.msrb.mxu0 %v3142_v39  ;;  %v2643_v39 = vsel %vm3426_vm10, 1.0, %v5365_v48  ;;  %v839_v18 = vadd.s32 248, %v3086_v13  ;;  %vm3498_vm6 = vmand %vm5422_vm4, %vm1006_vm0  ;;  %v3517_v1 = vsub.f32 %v2642_v42, %v2642_v42  ;;  %vm971_vm0 = vcmp.ge.s32.totalorder %v838_v53, %v3105_v24 }
  0x47   :  { %1413 = vmatpush.msra.mxu2 %v3244_v11  ;;  %2721 = vmatpush.msk.msra.mxu3 %vm3167_vm8, %v5356_v21  ;;  %v3490_v51 = vsub.f32 %v2643_v39, %v2643_v39  ;;  %v1350_v55 = vand.u32 4294901760, %v1349_v37  ;;  %vm1036_vm4 = vcmp.lt.s32.totalorder %v838_v53, %v3118_v29  ;;  %v1362_v39 = vand.u32 4294901760, %v1361_v61 }
  0x48   :  { %1321 = vmatpush.msra.mxu1 %v1320_v20  ;;  %768 = vmatmul.f32.vlgmr.msrb.gmra.mxu2 %v2975_v17  ;;  %v5423_v20 = vmov 0  ;;  %v5283_v37 = vand.u32 4294901760, %v3517_v1 }
  0x49   :  { %2704 = vmatpush.msk.msra.mxu0 %vm3146_vm5, %v5356_v21  ;;  %1416 = vmatpush.msra.mxu2 %v3265_v19  ;;  %v5424_v20 = vsel %vm3498_vm6, 4294967295, %v5423_v20  ;;  %v5279_v4 = vand.u32 4294901760, %v3490_v51 }
  0x4a   :  { %1327 = vmatpush.msra.mxu1 %v1326_v5  ;;  %2722 = vmatpush.msk.msra.mxu3 %vm3185_vm11, %v5356_v21  ;;  %v2640_v5 = vsel %vm3498_vm6, 1.0, %v5365_v48 }
  0x4b   :  { %708 = vmatmul.f32.vlgmr.msrb.gmra.mxu0 %v2989_v25  ;;  %793 = vmatmul.f32.vlgmr.msrb.gmra.mxu3 %v2975_v17  ;;  %v5284_v17 = vand.u32 4294901760, %v3452_v30  ;;  %v2641_v25 = vsel %vm3473_vm15, 1.0, %v5365_v48  ;;  %v3549_v42 = vsub.f32 %v2640_v5, %v2640_v5  ;;  %v5429_v5 = vmov 0 }
  0x4c   :  { %1333 = vmatpush.msra.mxu1 %v1332_v36  ;;  %2705 = vmatpush.msk.msra.mxu0 %vm3167_vm8, %v5356_v21  ;;  %v3533_v36 = vsub.f32 %v2641_v25, %v2641_v25  ;;  %v1368_v25 = vand.u32 4294901760, %v1367_v63 }
  0x4d   :  { %1419 = vmatpush.msra.mxu2 %v3277_v16  ;;  %2723 = vmatpush.msk.msra.mxu3 %vm3207_vm14, %v5356_v21  ;;  %v1373_v27 = vsub.f32 %v3452_v30, %v5284_v17 }
  0x4e   :  { %1339 = vmatpush.msra.mxu1 %v1338_v6  ;;  %2706 = vmatpush.msk.msra.mxu0 %vm3185_vm11, %v5356_v21  ;;  %v837_v6 = vadd.s32 232, %v3086_v13  ;;  %vm5425_vm11 = vcmp.lt.s32.totalorder %v839_v18, %v3118_v29  ;;  %v5286_v61 = vand.u32 4294901760, %v3533_v36 }
  0x4f   :  { %735 = vmatmul.f32.vlgmr.msrb.gmra.mxu1 %v3003_v34  ;;  %1422 = vmatpush.msra.mxu2 %v3300_v31  ;;  %v1356_v34 = vand.u32 4294901760, %v1355_v49  ;;  %v836_v49 = vadd.s32 224, %v3086_v13  ;;  %v1374_v63 = vand.u32 4294901760, %v1373_v27 }
  0x50   :  { %1345 = vmatpush.msra.mxu1 %v1344_v45  ;;  %2724 = vmatpush.msk.msra.mxu3 %vm3231_vm1, %v5356_v21  ;;  %v5427_v45 = vmov 0  ;;  %v1391_v17 = vsub.f32 %v3533_v36, %v5286_v61 }
  0x51   :  { %2707 = vmatpush.msk.msra.mxu0 %vm3207_vm14, %v5356_v21  ;;  %1425 = vmatpush.msra.mxu2 %v3346_v44  ;;  %vm5426_vm14 = vcmp.ge.s32.totalorder %v839_v18, %v3105_v24  ;;  %v1379_v18 = vsub.f32 %v3490_v51, %v5279_v4  ;;  %v5287_v4 = vand.u32 4294901760, %v3549_v42 }
  0x52   :  { %1351 = vmatpush.msra.mxu1 %v1350_v55  ;;  %vm3555_vm6 = vmand %vm5426_vm14, %vm5425_vm11  ;;  %2725 = vmatpush.msk.msra.mxu3 %vm3250_vm2, %v5356_v21  ;;  %v835_v55 = vadd.s32 216, %v3086_v13  ;;  %vm970_vm14 = vcmp.ge.s32.totalorder %v837_v6, %v3105_v24 }
  0x53   :  { %v5428_v45 = vsel %vm3555_vm6, 4294967295, %v5427_v45  ;;  %2708 = vmatpush.msk.msra.mxu0 %vm3231_vm1, %v5356_v21  ;;  %1428 = vmatpush.msra.mxu2 %v3381_v54  ;;  %vm3576_vm11 = vmand %vm971_vm0, %vm1036_vm4  ;;  %vm1035_vm1 = vcmp.lt.s32.totalorder %v837_v6, %v3118_v29  ;;  %v2671_v53 = vsel %vm3555_vm6, 1.0, %v5365_v48  ;;  %vm1034_vm4 = vcmp.lt.s32.totalorder %v836_v49, %v3118_v29 }
  0x54   :  { %1357 = vmatpush.msra.mxu1 %v1356_v34  ;;  %v5430_v5 = vsel %vm3576_vm11, 4294967295, %v5429_v5  ;;  %2726 = vmatpush.msk.msra.mxu3 %vm3283_vm9, %v5356_v21  ;;  %v1385_v34 = vsub.f32 %v3517_v1, %v5283_v37  ;;  %v2670_v27 = vsel %vm3576_vm11, 1.0, %v5365_v48  ;;  %vm968_vm0 = vcmp.ge.s32.totalorder %v835_v55, %v3105_v24 }
  0x55   :  { %2709 = vmatpush.msk.msra.mxu0 %vm3250_vm2, %v5356_v21  ;;  %1431 = vmatpush.msra.mxu2 %v3404_v56  ;;  %vm3609_vm2 = vmand %vm970_vm14, %vm1035_vm1  ;;  %vm1033_vm6 = vcmp.lt.s32.totalorder %v835_v55, %v3118_v29  ;;  %v1380_v37 = vand.u32 4294901760, %v1379_v18  ;;  %v3619_v41 = vsub.f32 %v2671_v53, %v2671_v53  ;;  %vm5433_vm1 = vcmp.ge.s32.totalorder %v836_v49, %v3105_v24 }
  0x56   :  { %1363 = vmatpush.msra.mxu1 %v1362_v39  ;;  %2727 = vmatpush.msk.msra.mxu3 %vm3306_vm13, %v5356_v21  ;;  %v5431_v39 = vmov 0  ;;  %vm3629_vm14 = vmand %vm5433_vm1, %vm1034_vm4  ;;  %v1397_v18 = vsub.f32 %v3549_v42, %v5287_v4  ;;  %v3637_v53 = vsub.f32 %v2670_v27, %v2670_v27  ;;  %v2669_v61 = vsel %vm3609_vm2, 1.0, %v5365_v48 }
  0x57   :  { %2710 = vmatpush.msk.msra.mxu0 %vm3283_vm9, %v5356_v21  ;;  %v5432_v39 = vsel %vm3609_vm2, 4294967295, %v5431_v39  ;;  %1434 = vmatpush.msra.mxu2 %v3417_v58  ;;  %vm3646_vm4 = vmand %vm968_vm0, %vm1033_vm6  ;;  %v2668_v55 = vsel %vm3629_vm14, 1.0, %v5365_v48  ;;  %vm5438_vm6 = vnez %v5409_v50  ;;  %v3667_v27 = vsub.f32 %v2669_v61, %v2669_v61 }
  0x58   :  { %1369 = vmatpush.msra.mxu1 %v1368_v25  ;;  %2728 = vmatpush.msk.msra.mxu3 %vm3330_vm3, %v5356_v21  ;;  %v1386_v25 = vand.u32 4294901760, %v1385_v34  ;;  %v1647_v34 = vand.u32 4294901760, %v3619_v41  ;;  %v1398_v4 = vand.u32 4294901760, %v1397_v18  ;;  %v5291_v35 = vand.u32 4294901760, %v3637_v53 }
  0x59   :  { %2711 = vmatpush.msk.msra.mxu0 %vm3306_vm13, %v5356_v21  ;;  %1437 = vmatpush.msra.mxu2 %v3431_v23  ;;  %vm5439_vm0 = vnez %v5411_v57  ;;  %v3681_v61 = vsub.f32 %v2668_v55, %v2668_v55  ;;  %v5292_v55 = vand.u32 4294901760, %v3667_v27  ;;  %v5490_v6 = vmov 0 }
  0x5a   :  { %1375 = vmatpush.msra.mxu1 %v1374_v63  ;;  %2729 = vmatpush.msk.msra.mxu3 %vm3352_vm7, %v5356_v21  ;;  %v1392_v63 = vand.u32 4294901760, %v1391_v17  ;;  %v2667_v17 = vsel %vm3646_vm4, 1.0, %v5365_v48  ;;  %v850_v49 = vadd.s32 336, %v3086_v13 }
  0x5b   :  { %2712 = vmatpush.msk.msra.mxu0 %vm3330_vm3, %v5356_v21  ;;  %1440 = vmatpush.msra.mxu2 %v3452_v30  ;;  %v3687_v18 = vsub.f32 %v2667_v17, %v2667_v17  ;;  %v5293_v17 = vand.u32 4294901760, %v3681_v61  ;;  %v1660_v40 = vsub.f32 %v3667_v27, %v5292_v55 }
  0x5c   :  { %1381 = vmatpush.msra.mxu1 %v1380_v37  ;;  %2730 = vmatpush.msk.msra.mxu3 %vm5438_vm6, %v5356_v21  ;;  %v834_v37 = vadd.s32 208, %v3086_v13 }
  0x5d   :  { %2713 = vmatpush.msk.msra.mxu0 %vm3352_vm7, %v5356_v21  ;;  %1443 = vmatpush.msra.mxu2 %v3490_v51  ;;  %v1666_v47 = vsub.f32 %v3681_v61, %v5293_v17  ;;  %v833_v17 = vadd.s32 200, %v3086_v13 }
  0x5e   :  { %1387 = vmatpush.msra.mxu1 %v1386_v25  ;;  %2731 = vmatpush.msk.msra.mxu3 %vm5439_vm0, %v5356_v21  ;;  %v1648_v25 = vsub.f32 %v3619_v41, %v1647_v34  ;;  %vm967_vm1 = vcmp.ge.s32.totalorder %v834_v37, %v3105_v24 }
  0x5f   :  { %2714 = vmatpush.msk.msra.mxu0 %vm5438_vm6, %v5356_v21  ;;  %1446 = vmatpush.msra.mxu2 %v3517_v1  ;;  %vm1032_vm6 = vcmp.lt.s32.totalorder %v834_v37, %v3118_v29  ;;  %v849_v37 = vadd.s32 328, %v3086_v13 }
  0x60   :  { %1393 = vmatpush.msra.mxu1 %v1392_v63  ;;  %2732 = vmatpush.msk.msra.mxu3 %vm3426_vm10, %v5356_v21  ;;  %v1654_v63 = vsub.f32 %v3637_v53, %v5291_v35  ;;  %v1671_v35 = vand.u32 4294901760, %v3687_v18 }
  0x61   :  { %2715 = vmatpush.msk.msra.mxu0 %vm5439_vm0, %v5356_v21  ;;  %1449 = vmatpush.msra.mxu2 %v3533_v36  ;;  %vm3713_vm0 = vmand %vm967_vm1, %vm1032_vm6  ;;  %vm5443_vm6 = vnez %v5424_v20  ;;  %vm5445_vm1 = vnez %v5395_v60  ;;  %v1667_v60 = vand.u32 4294901760, %v1666_v47 }
  0x62   :  { %1399 = vmatpush.msra.mxu1 %v1398_v4  ;;  %2733 = vmatpush.msk.msra.mxu3 %vm3447_vm12, %v5356_v21  ;;  %v1649_v4 = vand.u32 4294901760, %v1648_v25  ;;  %v1655_v25 = vand.u32 4294901760, %v1654_v63  ;;  %v2666_v55 = vsel %vm3713_vm0, 1.0, %v5365_v48  ;;  %v1672_v63 = vsub.f32 %v3687_v18, %v1671_v35 }
  0x63   :  { %2716 = vmatpush.msk.msra.mxu0 %vm3426_vm10, %v5356_v21  ;;  %1452 = vmatpush.msra.mxu2 %v3549_v42 }
  0x64   :  { %2736 = vmatpush.msk.msrb.mxu1 %vm3146_vm5, %v5356_v21  ;;  %2734 = vmatpush.msk.msra.mxu3 %vm3473_vm15, %v5356_v21  ;;  %vm5442_vm5 = vnez %v5428_v45 }
  0x65   :  { %2752 = vmatpush.msk.msrb.mxu2 %vm5442_vm5, %v5356_v21  ;;  %2717 = vmatpush.msk.msra.mxu0 %vm3447_vm12, %v5356_v21 }
  0x66   :  { %2737 = vmatpush.msk.msrb.mxu1 %vm3167_vm8, %v5356_v21  ;;  %2735 = vmatpush.msk.msra.mxu3 %vm5443_vm6, %v5356_v21  ;;  %vm5444_vm8 = vnez %v5393_v52  ;;  %v1661_v52 = vand.u32 4294901760, %v1660_v40  ;;  %v832_v40 = vadd.s32 192, %v3086_v13 }
  0x67   :  { %2753 = vmatpush.msk.msrb.mxu2 %vm3576_vm11, %v5356_v21  ;;  %2718 = vmatpush.msk.msra.mxu0 %vm3473_vm15, %v5356_v21  ;;  %vm1031_vm11 = vcmp.lt.s32.totalorder %v833_v17, %v3118_v29 }
  0x68   :  { %2738 = vmatpush.msk.msrb.mxu1 %vm5444_vm8, %v5356_v21  ;;  %1650 = vmatpush.msrb.mxu3 %v1649_v4  ;;  %v3761_v4 = vsub.f32 %v2666_v55, %v2666_v55  ;;  %vm5446_vm8 = vnez %v5397_v9  ;;  %v1673_v55 = vand.u32 4294901760, %v1672_v63  ;;  %vm965_vm5 = vcmp.ge.s32.totalorder %v832_v40, %v3105_v24 }
  0x69   :  { %2754 = vmatpush.msk.msrb.mxu2 %vm3609_vm2, %v5356_v21  ;;  %2719 = vmatpush.msk.msra.mxu0 %vm5443_vm6, %v5356_v21  ;;  %vm1030_vm6 = vcmp.lt.s32.totalorder %v832_v40, %v3118_v29 }
  0x6a   :  { %2739 = vmatpush.msk.msrb.mxu1 %vm5445_vm1, %v5356_v21  ;;  %1656 = vmatpush.msrb.mxu3 %v1655_v25  ;;  %vm966_vm1 = vcmp.ge.s32.totalorder %v833_v17, %v3105_v24  ;;  %v5450_v17 = vmov 0 }
  0x6b   :  { %1501 = vmatpush.msrb.mxu0 %v1306_v10  ;;  %2755 = vmatpush.msk.msrb.mxu2 %vm3629_vm14, %v5356_v21  ;;  %vm3777_vm2 = vmand %vm966_vm1, %vm1031_vm11  ;;  %vm964_vm1 = vcmp.ge.s32.totalorder %v831_v59, %v3105_v24 }
  0x6c   :  { %2740 = vmatpush.msk.msrb.mxu1 %vm5446_vm8, %v5356_v21  ;;  %1662 = vmatpush.msrb.mxu3 %v1661_v52  ;;  %vm5449_vm8 = vnez %v5399_v14  ;;  %v2665_v9 = vsel %vm3777_vm2, 1.0, %v5365_v48  ;;  %v1677_v14 = vand.u32 4294901760, %v3761_v4  ;;  %vm3798_vm11 = vmand %vm965_vm5, %vm1030_vm6  ;;  %v5452_v52 = vmov 0 }
  0x6d   :  { %1505 = vmatpush.msrb.mxu0 %v1312_v15  ;;  %2756 = vmatpush.msk.msrb.mxu2 %vm3646_vm4, %v5356_v21  ;;  %v3795_v10 = vsub.f32 %v2665_v9, %v2665_v9  ;;  %v5451_v17 = vsel %vm3798_vm11, 4294967295, %v5450_v17  ;;  %v2664_v3 = vsel %vm3798_vm11, 1.0, %v5365_v48  ;;  %v830_v15 = vadd.s32 176, %v3086_v13 }
  0x6e   :  { %2741 = vmatpush.msk.msrb.mxu1 %vm5449_vm8, %v5356_v21  ;;  %1668 = vmatpush.msrb.mxu3 %v1667_v60  ;;  %vm1029_vm8 = vcmp.lt.s32.totalorder %v831_v59, %v3118_v29  ;;  %v1678_v26 = vsub.f32 %v3761_v4, %v1677_v14  ;;  %v3819_v47 = vsub.f32 %v2664_v3, %v2664_v3 }
  0x6f   :  { %1509 = vmatpush.msrb.mxu0 %v1318_v62  ;;  %2757 = vmatpush.msk.msrb.mxu2 %vm3713_vm0, %v5356_v21  ;;  %v1683_v63 = vand.u32 4294901760, %v3795_v10  ;;  %vm963_vm5 = vcmp.ge.s32.totalorder %v830_v15, %v3105_v24  ;;  %vm1028_vm6 = vcmp.lt.s32.totalorder %v830_v15, %v3118_v29  ;;  %v829_v62 = vadd.s32 168, %v3086_v13 }
  0x70   :  { %2742 = vmatpush.msk.msrb.mxu1 %vm3283_vm9, %v5356_v21  ;;  %vm3822_vm9 = vmand %vm964_vm1, %vm1029_vm8  ;;  %1674 = vmatpush.msrb.mxu3 %v1673_v55  ;;  %v1679_v60 = vand.u32 4294901760, %v1678_v26  ;;  %v1689_v55 = vand.u32 4294901760, %v3819_v47  ;;  %v5456_v26 = vmov 0 }
  0x71   :  { %v5453_v52 = vsel %vm3822_vm9, 4294967295, %v5452_v52  ;;  %v2663_v11 = vsel %vm3822_vm9, 1.0, %v5365_v48  ;;  %1513 = vmatpush.msrb.mxu0 %v1324_v33  ;;  %2758 = vmatpush.msk.msrb.mxu2 %vm3777_vm2, %v5356_v21  ;;  %v1684_v32 = vsub.f32 %v3795_v10, %v1683_v63  ;;  %vm962_vm1 = vcmp.ge.s32.totalorder %v829_v62, %v3105_v24 }
  0x72   :  { %2743 = vmatpush.msk.msrb.mxu1 %vm3306_vm13, %v5356_v21  ;;  %v3843_v40 = vsub.f32 %v2663_v11, %v2663_v11  ;;  %vm3846_vm13 = vmand %vm963_vm5, %vm1028_vm6  ;;  %vm1027_vm8 = vcmp.lt.s32.totalorder %v829_v62, %v3118_v29  ;;  %v828_v33 = vadd.s32 160, %v3086_v13  ;;  %1680 = vmatpush.msrb.mxu3 %v1679_v60  ;;  %v1690_v38 = vsub.f32 %v3819_v47, %v1689_v55 }
  0x73   :  { %v2662_v19 = vsel %vm3846_vm13, 1.0, %v5365_v48  ;;  %1517 = vmatpush.msrb.mxu0 %v1330_v7  ;;  %v1685_v59 = vand.u32 4294901760, %v1684_v32  ;;  %2759 = vmatpush.msk.msrb.mxu2 %vm3798_vm11, %v5356_v21  ;;  %v827_v7 = vadd.s32 152, %v3086_v13  ;;  %v5458_v32 = vmov 0 }
  0x74   :  { %2744 = vmatpush.msk.msrb.mxu1 %vm3330_vm3, %v5356_v21  ;;  %v3864_v3 = vsub.f32 %v2662_v19, %v2662_v19  ;;  %v1695_v15 = vand.u32 4294901760, %v3843_v40  ;;  %vm3867_vm3 = vmand %vm962_vm1, %vm1027_vm8  ;;  %vm961_vm5 = vcmp.ge.s32.totalorder %v828_v33, %v3105_v24  ;;  %vm1026_vm6 = vcmp.lt.s32.totalorder %v828_v33, %v3118_v29 }
  0x75   :  { %v5457_v26 = vsel %vm3867_vm3, 4294967295, %v5456_v26  ;;  %v2661_v16 = vsel %vm3867_vm3, 1.0, %v5365_v48  ;;  %1686 = vmatpush.msrb.mxu3 %v1685_v59  ;;  %1521 = vmatpush.msrb.mxu0 %v1336_v43  ;;  %v1691_v11 = vand.u32 4294901760, %v1690_v38  ;;  %vm5460_vm1 = vnez %v5409_v50 }
  0x76   :  { %2745 = vmatpush.msk.msrb.mxu1 %vm3352_vm7, %v5356_v21  ;;  %v1696_v8 = vsub.f32 %v3843_v40, %v1695_v15  ;;  %v3888_v62 = vsub.f32 %v2661_v16, %v2661_v16  ;;  %v1701_v60 = vand.u32 4294901760, %v3864_v3  ;;  %vm3891_vm7 = vmand %vm961_vm5, %vm1026_vm6  ;;  %2760 = vmatpush.msk.msrb.mxu2 %vm3822_vm9, %v5356_v21  ;;  %vm960_vm8 = vcmp.ge.s32.totalorder %v827_v7, %v3105_v24 }
  0x77   :  { %v5459_v32 = vsel %vm3891_vm7, 4294967295, %v5458_v32  ;;  %v2660_v31 = vsel %vm3891_vm7, 1.0, %v5365_v48  ;;  %vm1025_vm11 = vcmp.lt.s32.totalorder %v827_v7, %v3118_v29  ;;  %v826_v43 = vadd.s32 144, %v3086_v13  ;;  %1692 = vmatpush.msrb.mxu3 %v1691_v11  ;;  %1525 = vmatpush.msrb.mxu0 %v1342_v2 }
  0x78   :  { %2746 = vmatpush.msk.msrb.mxu1 %vm5460_vm1, %v5356_v21  ;;  %v1697_v19 = vand.u32 4294901760, %v1696_v8  ;;  %v1702_v50 = vsub.f32 %v3864_v3, %v1701_v60  ;;  %v3912_v33 = vsub.f32 %v2660_v31, %v2660_v31  ;;  %v1707_v59 = vand.u32 4294901760, %v3888_v62  ;;  %vm3915_vm5 = vmand %vm960_vm8, %vm1025_vm11  ;;  %2761 = vmatpush.msk.msrb.mxu2 %vm3846_vm13, %v5356_v21 }
  0x79   :  { %v5461_v38 = vmov 0  ;;  %vm5463_vm6 = vnez %v5411_v57  ;;  %v2659_v44 = vsel %vm3915_vm5, 1.0, %v5365_v48  ;;  %vm959_vm1 = vcmp.ge.s32.totalorder %v826_v43, %v3105_v24  ;;  %1529 = vmatpush.msrb.mxu0 %v1348_v28 }
  0x7a   :  { %v5462_v38 = vsel %vm3915_vm5, 4294967295, %v5461_v38  ;;  %2747 = vmatpush.msk.msrb.mxu1 %vm5463_vm6, %v5356_v21  ;;  %vm1024_vm9 = vcmp.lt.s32.totalorder %v826_v43, %v3118_v29  ;;  %v825_v2 = vadd.s32 136, %v3086_v13  ;;  %1698 = vmatpush.msrb.mxu3 %v1697_v19  ;;  %v1703_v16 = vand.u32 4294901760, %v1702_v50 }
  0x7b   :  { %v1708_v57 = vsub.f32 %v3888_v62, %v1707_v59  ;;  %v3936_v7 = vsub.f32 %v2659_v44, %v2659_v44  ;;  %v1713_v11 = vand.u32 4294901760, %v3912_v33  ;;  %vm3939_vm11 = vmand %vm959_vm1, %vm1024_vm9  ;;  %v5464_v8 = vmov 0  ;;  %2762 = vmatpush.msk.msrb.mxu2 %vm3867_vm3, %v5356_v21  ;;  %1533 = vmatpush.msrb.mxu0 %v1354_v0 }
  0x7c   :  { %v5465_v8 = vsel %vm3939_vm11, 4294967295, %v5464_v8  ;;  %2748 = vmatpush.msk.msrb.mxu1 %vm3426_vm10, %v5356_v21  ;;  %v2658_v54 = vsel %vm3939_vm11, 1.0, %v5365_v48  ;;  %vm958_vm8 = vcmp.ge.s32.totalorder %v825_v2, %v3105_v24  ;;  %vm1023_vm6 = vcmp.lt.s32.totalorder %v825_v2, %v3118_v29  ;;  %1704 = vmatpush.msrb.mxu3 %v1703_v16 }
  0x7d   :  { %v824_v28 = vadd.s32 128, %v3086_v13  ;;  %v1709_v31 = vand.u32 4294901760, %v1708_v57  ;;  %v1714_v12 = vsub.f32 %v3912_v33, %v1713_v11  ;;  %v3960_v43 = vsub.f32 %v2658_v54, %v2658_v54  ;;  %vm3963_vm10 = vmand %vm958_vm8, %vm1023_vm6  ;;  %2763 = vmatpush.msk.msrb.mxu2 %vm3891_vm7, %v5356_v21 }
  0x7e   :  { %v5306_v19 = vand.u32 4294901760, %v3936_v7  ;;  %v5466_v50 = vmov 0  ;;  %2749 = vmatpush.msk.msrb.mxu1 %vm3447_vm12, %v5356_v21  ;;  %v2657_v56 = vsel %vm3963_vm10, 1.0, %v5365_v48  ;;  %v5468_v0 = vand.u32 4294901760, %v3417_v58 }
  0x7f   :  { %v5467_v50 = vsel %vm3963_vm10, 4294967295, %v5466_v50  ;;  %vm957_vm9 = vcmp.ge.s32.totalorder %v824_v28, %v3105_v24  ;;  %vm1022_vm1 = vcmp.lt.s32.totalorder %v824_v28, %v3118_v29  ;;  %1710 = vmatpush.msrb.mxu3 %v1709_v31  ;;  %v1715_v44 = vand.u32 4294901760, %v1714_v12  ;;  %2764 = vmatpush.msk.msrb.mxu2 %vm3915_vm5, %v5356_v21 }
  0x80   :  { %1537 = vmatpush.msrb.mxu0 %v5468_v0  ;;  %v1720_v2 = vsub.f32 %v3936_v7, %v5306_v19  ;;  %v3983_v16 = vsub.f32 %v2657_v56, %v2657_v56  ;;  %v5305_v22 = vand.u32 4294901760, %v3960_v43  ;;  %vm3986_vm12 = vmand %vm957_vm9, %vm1022_vm1  ;;  %v5469_v57 = vmov 0  ;;  %2750 = vmatpush.msk.msrb.mxu1 %vm3473_vm15, %v5356_v21 }
  0x81   :  { %v5470_v57 = vsel %vm3986_vm12, 4294967295, %v5469_v57  ;;  %v2656_v58 = vsel %vm3986_vm12, 1.0, %v5365_v48  ;;  %1716 = vmatpush.msrb.mxu3 %v1715_v44  ;;  %v5471_v54 = vand.u32 4294901760, %v3431_v23  ;;  %2765 = vmatpush.msk.msrb.mxu2 %vm3939_vm11, %v5356_v21  ;;  %vm5472_vm15 = vnez %v5424_v20 }
  0x82   :  { %v1721_v28 = vand.u32 4294901760, %v1720_v2  ;;  %v1726_v31 = vsub.f32 %v3960_v43, %v5305_v22  ;;  %v4004_v12 = vsub.f32 %v2656_v58, %v2656_v58  ;;  %v5304_v56 = vand.u32 4294901760, %v3983_v16  ;;  %2751 = vmatpush.msk.msrb.mxu1 %vm5472_vm15, %v5356_v21 }
  0x83   :  { %1541 = vmatpush.msrb.mxu0 %v5471_v54  ;;  %v5473_v23 = vand.u32 4294901760, %v3452_v30  ;;  %2766 = vmatpush.msk.msrb.mxu2 %vm3963_vm10, %v5356_v21  ;;  %v5474_v2 = vand.u32 4294901760, %v3490_v51  ;;  %v5475_v58 = vand.u32 4294901760, %v3517_v1  ;;  %v5477_v51 = vand.u32 4294901760, %v3549_v42 }
  0x84   :  { %1722 = vmatpush.msrb.mxu3 %v1721_v28  ;;  %v1727_v46 = vand.u32 4294901760, %v1726_v31  ;;  %v1732_v0 = vsub.f32 %v3983_v16, %v5304_v56  ;;  %v5303_v44 = vand.u32 4294901760, %v4004_v12  ;;  %v5476_v28 = vand.u32 4294901760, %v3533_v36 }
  0x85   :  { %1545 = vmatpush.msrb.mxu0 %v5473_v23  ;;  %2767 = vmatpush.msk.msrb.mxu2 %vm3986_vm12, %v5356_v21  ;;  %vm5478_vm8 = vnez %v5428_v45  ;;  %vm5479_vm6 = vnez %v5430_v5  ;;  %vm5480_vm9 = vnez %v5432_v39  ;;  %v5483_v5 = vand.u32 4294901760, %v3681_v61 }
  0x86   :  { %1728 = vmatpush.msrb.mxu3 %v1727_v46  ;;  %v1733_v20 = vand.u32 4294901760, %v1732_v0  ;;  %v1738_v30 = vsub.f32 %v4004_v12, %v5303_v44  ;;  %v5486_v39 = vmov 0 }
  0x87   :  { %1549 = vmatpush.msrb.mxu0 %v5474_v2 }
  0x88   :  { %1734 = vmatpush.msrb.mxu3 %v1733_v20  ;;  %v1739_v54 = vand.u32 4294901760, %v1738_v30  ;;  %v797_v20 = vld [vmem:[%s5268_s2] sm:$0xff] }
  0x89   :  { %1553 = vmatpush.msrb.mxu0 %v5475_v58 }
  0x8a   :  { %1740 = vmatpush.msrb.mxu3 %v1739_v54  ;;  %v799_v54 = vunpack.c.l.bf16 %v797_v20 }
  0x8b   :  { %1557 = vmatpush.msrb.mxu0 %v5476_v28 }
  0x8d   :  { %1561 = vmatpush.msrb.mxu0 %v5477_v51 }
  0x90   :  { %v83_v31 = vpop.f32.mrf.mxu0 }
  0x94   :  { %v124_v23 = vpop.f32.mrf.mxu1  ;;  %v181_v2 = vpop.f32.mrf.mxu3 }
  0x95   :  { %v154_v46 = vpop.f32.mrf.mxu2  ;;  %v125_v0 = vadd.f32 %v124_v23, %v83_v31 }
  0x97   :  { %v155_v44 = vadd.f32 %v154_v46, %v125_v0 }
  0x99   :  { %v182_v1 = vadd.f32 %v181_v2, %v155_v44 }
  0x9a   :  { %v214_v58 = vpop.f32.mrf.mxu0 }
  0x9b   :  { %v215_v30 = vadd.f32 %v214_v58, %v182_v1  ;;  %v5481_v58 = vand.u32 4294901760, %v3637_v53 }
  0x9d   :  { %v239_v56 = vpop.f32.mrf.mxu1  ;;  %v268_v28 = vpop.f32.mrf.mxu2 }
  0x9e   :  { %v240_v36 = vadd.f32 %v239_v56, %v215_v30  ;;  %v800_v30 = vunpack.c.h.bf16 %v797_v20  ;;  %v852_v20 = vadd.s32 352, %v3086_v13 }
  0xa0   :  { %v803_v22 = vmul.f32 %v799_v54, %v240_v36  ;;  %v309_v42 = vpop.f32.mrf.mxu3  ;;  %v854_v54 = vadd.s32 368, %v3086_v13  ;;  %vm985_vm5 = vcmp.ge.s32.totalorder %v852_v20, %v3105_v24  ;;  %vm1050_vm7 = vcmp.lt.s32.totalorder %v852_v20, %v3118_v29 }
  0xa1   :  { %v310_v19 = vadd.f32 %v309_v42, %v268_v28  ;;  %v853_v28 = vadd.s32 360, %v3086_v13 }
  0xa2   :  { %v4039_v51 = vand.u32 4294901760, %v803_v22  ;;  %vm1052_vm12 = vcmp.lt.s32.totalorder %v854_v54, %v3118_v29 }
  0xa3   :  { %v339_v23 = vpop.f32.mrf.mxu0  ;;  %vm1051_vm10 = vcmp.lt.s32.totalorder %v853_v28, %v3118_v29 }
  0xa4   :  { %v1296_v31 = vsub.f32 %v803_v22, %v4039_v51  ;;  %1401 = vmatmul.f32.vlgmr.msra.gmra.mxu1 %v4039_v51  ;;  %v340_v46 = vadd.f32 %v339_v23, %v310_v19  ;;  %v855_v19 = vadd.s32 376, %v3086_v13 }
  0xa5   :  { %2768 = vmatpush.msk.msra.mxu1 %vm5478_vm8, %v5356_v21  ;;  %v366_v44 = vpop.f32.mrf.mxu1 }
  0xa6   :  { %1455 = vmatmul.f32.vlgmr.msra.gmra.mxu2 %v1296_v31  ;;  %v1297_v0 = vand.u32 4294901760, %v1296_v31  ;;  %v367_v56 = vadd.f32 %v366_v44, %v340_v46  ;;  %vm988_vm1 = vcmp.ge.s32.totalorder %v855_v19, %v3105_v24  ;;  %vm1053_vm15 = vcmp.lt.s32.totalorder %v855_v19, %v3118_v29 }
  0xa7   :  { %2769 = vmatpush.msk.msra.mxu1 %vm5479_vm6, %v5356_v21  ;;  %1842 = vmatpush.msra.mxu2 %v1647_v34  ;;  %v399_v22 = vpop.f32.mrf.mxu2  ;;  %vm4090_vm11 = vmand %vm988_vm1, %vm1053_vm15  ;;  %v5488_v46 = vmov 0  ;;  %vm982_vm1 = vcmp.ge.s32.totalorder %v849_v37, %v3105_v24  ;;  %vm1047_vm15 = vcmp.lt.s32.totalorder %v849_v37, %v3118_v29 }
  0xa8   :  { %1494 = vmatmul.f32.vlgmr.msra.gmra.mxu3 %v1297_v0  ;;  %v1298_v2 = vsub.f32 %v1296_v31, %v1297_v0  ;;  %v400_v1 = vadd.f32 %v399_v22, %v367_v56  ;;  %v5482_v31 = vand.u32 4294901760, %v3667_v27 }
  0xa9   :  { %2770 = vmatpush.msk.msra.mxu1 %vm5480_vm9, %v5356_v21  ;;  %1846 = vmatpush.msra.mxu2 %v5481_v58 }
  0xaa   :  { %2784 = vmatpush.msk.msra.mxu3 %vm5478_vm8, %v5356_v21  ;;  %v424_v34 = vpop.f32.mrf.mxu3  ;;  %v1299_v36 = vand.u32 4294901760, %v1298_v2  ;;  %vm987_vm8 = vcmp.ge.s32.totalorder %v854_v54, %v3105_v24  ;;  %v848_v2 = vadd.s32 320, %v3086_v13 }
  0xab   :  { %v425_v42 = vadd.f32 %v424_v34, %v400_v1  ;;  %2771 = vmatpush.msk.msra.mxu1 %vm3629_vm14, %v5356_v21  ;;  %1850 = vmatpush.msra.mxu2 %v5482_v31  ;;  %vm4101_vm3 = vmand %vm987_vm8, %vm1052_vm12  ;;  %vm5496_vm8 = vnez %v5457_v26  ;;  %v5502_v34 = vmov 0 }
  0xac   :  { %2785 = vmatpush.msk.msra.mxu3 %vm5479_vm6, %v5356_v21  ;;  %1300 = vmatmul.f32.vlgmr.msra.gmra.mxu0 %v1299_v36  ;;  %vm986_vm6 = vcmp.ge.s32.totalorder %v853_v28, %v3105_v24  ;;  %v5487_v39 = vsel %vm4101_vm3, 4294967295, %v5486_v39  ;;  %vm4124_vm12 = vmand %vm985_vm5, %vm1050_vm7  ;;  %vm983_vm5 = vcmp.ge.s32.totalorder %v850_v49, %v3105_v24  ;;  %v843_v28 = vadd.s32 280, %v3086_v13 }
  0xad   :  { %v804_v45 = vmul.f32 %v800_v30, %v425_v42  ;;  %1600 = vmatmul.f32.vlgmr.msrb.gmra.mxu1 %v4039_v51  ;;  %1748 = vmatpush.msra.mxu0 %v3619_v41  ;;  %v5491_v6 = vsel %vm4124_vm12, 4294967295, %v5490_v6  ;;  %v2684_v56 = vsel %vm4124_vm12, 1.0, %v5365_v48  ;;  %v845_v30 = vadd.s32 296, %v3086_v13  ;;  %v453_v20 = vpop.f32.mrf.mxu0 }
  0xae   :  { %2772 = vmatpush.msk.msra.mxu1 %vm3646_vm4, %v5356_v21  ;;  %1854 = vmatpush.msra.mxu2 %v5483_v5  ;;  %v4179_v19 = vsub.f32 %v2684_v56, %v2684_v56  ;;  %v5517_v56 = vmov 0 }
  0xaf   :  { %v4084_v23 = vand.u32 4294901760, %v804_v45  ;;  %2786 = vmatpush.msk.msra.mxu3 %vm5480_vm9, %v5356_v21  ;;  %1751 = vmatpush.msra.mxu0 %v3637_v53  ;;  %vm4112_vm9 = vmand %vm986_vm6, %vm1051_vm10  ;;  %vm1048_vm10 = vcmp.lt.s32.totalorder %v850_v49, %v3118_v29  ;;  %v494_v36 = vpop.f32.mrf.mxu1  ;;  %v5514_v49 = vand.u32 4294901760, %v3960_v43 }
  0xb0   :  { %2773 = vmatpush.msk.msra.mxu1 %vm3713_vm0, %v5356_v21  ;;  %1858 = vmatpush.msra.mxu2 %v1671_v35  ;;  %v5489_v46 = vsel %vm4112_vm9, 4294967295, %v5488_v46  ;;  %v2687_v35 = vsel %vm4090_vm11, 1.0, %v5365_v48  ;;  %v2685_v0 = vsel %vm4112_vm9, 1.0, %v5365_v48  ;;  %vm4206_vm6 = vmand %vm983_vm5, %vm1048_vm10  ;;  %v5346_v1 = vand.u32 4294901760, %v4179_v19 }
  0xb1   :  { %v4106_v53 = vsub.f32 %v804_v45, %v4084_v23  ;;  %2787 = vmatpush.msk.msra.mxu3 %vm3629_vm14, %v5356_v21  ;;  %1754 = vmatpush.msra.mxu0 %v3667_v27  ;;  %v851_v27 = vadd.s32 344, %v3086_v13  ;;  %vm5492_vm14 = vnez %v5451_v17  ;;  %v847_v17 = vadd.s32 312, %v3086_v13 }
  0xb2   :  { %2774 = vmatpush.msk.msra.mxu1 %vm3777_vm2, %v5356_v21  ;;  %1862 = vmatpush.msra.mxu2 %v1677_v14  ;;  %v2686_v14 = vsel %vm4101_vm3, 1.0, %v5365_v48  ;;  %v2682_v54 = vsel %vm4206_vm6, 1.0, %v5365_v48  ;;  %v4285_v31 = vsub.f32 %v4179_v19, %v5346_v1 }
  0xb3   :  { %v1638_v44 = vand.u32 4294901760, %v4106_v53  ;;  %2788 = vmatpush.msk.msra.mxu3 %vm3646_vm4, %v5356_v21  ;;  %1757 = vmatpush.msra.mxu0 %v3681_v61  ;;  %vm5493_vm4 = vnez %v5453_v52  ;;  %vm1049_vm7 = vcmp.lt.s32.totalorder %v851_v27, %v3118_v29  ;;  %v4170_v22 = vsub.f32 %v2686_v14, %v2686_v14 }
  0xb4   :  { %2775 = vmatpush.msk.msra.mxu1 %vm5492_vm14, %v5356_v21  ;;  %1866 = vmatpush.msra.mxu2 %v1683_v63  ;;  %v4153_v63 = vsub.f32 %v2687_v35, %v2687_v35  ;;  %v5500_v52 = vmov 0  ;;  %vm980_vm10 = vcmp.ge.s32.totalorder %v847_v17, %v3105_v24  ;;  %v4294_v26 = vsub.f32 %v2682_v54, %v2682_v54 }
  0xb5   :  { %2789 = vmatpush.msk.msra.mxu3 %vm3713_vm0, %v5356_v21  ;;  %1563 = vmatmul.f32.vlgmr.msrb.gmra.mxu0 %v4039_v51  ;;  %v1639_v61 = vsub.f32 %v4106_v53, %v1638_v44  ;;  %vm984_vm0 = vcmp.ge.s32.totalorder %v851_v27, %v3105_v24  ;;  %v495_v35 = vadd.f32 %v494_v36, %v453_v20  ;;  %v5511_v27 = vmov 0 }
  0xb6   :  { %1760 = vmatpush.msra.mxu0 %v3687_v18  ;;  %2776 = vmatpush.msk.msra.mxu1 %vm5493_vm4, %v5356_v21  ;;  %v4172_v18 = vsub.f32 %v2685_v0, %v2685_v0  ;;  %v5353_v25 = vand.u32 4294901760, %v4153_v63  ;;  %v524_v0 = vpop.f32.mrf.mxu2  ;;  %v5617_v5 = vand.u32 4294901760, %v4294_v26 }
  0xb7   :  { %1870 = vmatpush.msra.mxu2 %v1689_v55  ;;  %2790 = vmatpush.msk.msra.mxu3 %vm3777_vm2, %v5356_v21  ;;  %v1640_v51 = vand.u32 4294901760, %v1639_v61  ;;  %vm4193_vm2 = vmand %vm984_vm0, %vm1049_vm7  ;;  %v5497_v55 = vmov 0  ;;  %vm1046_vm0 = vcmp.lt.s32.totalorder %v848_v2, %v3118_v29  ;;  %vm5499_vm7 = vnez %v5459_v32 }
  0xb8   :  { %1763 = vmatpush.msra.mxu0 %v3761_v4  ;;  %2777 = vmatpush.msk.msra.mxu1 %vm3846_vm13, %v5356_v21  ;;  %v5494_v4 = vmov 0  ;;  %v5498_v55 = vsel %vm4206_vm6, 4294967295, %v5497_v55  ;;  %v2683_v58 = vsel %vm4193_vm2, 1.0, %v5365_v48 }
  0xb9   :  { %1874 = vmatpush.msra.mxu2 %v1695_v15  ;;  %2791 = vmatpush.msk.msra.mxu3 %vm5492_vm14, %v5356_v21  ;;  %v5495_v4 = vsel %vm4193_vm2, 4294967295, %v5494_v4  ;;  %vm981_vm14 = vcmp.ge.s32.totalorder %v848_v2, %v3105_v24  ;;  %v5348_v15 = vand.u32 4294901760, %v4170_v22  ;;  %v4264_v9 = vsub.f32 %v2683_v58, %v2683_v58 }
  0xba   :  { %1641 = vmatmul.f32.vlgmr.msrb.gmra.mxu2 %v1640_v51  ;;  %1766 = vmatpush.msra.mxu0 %v3795_v10  ;;  %v846_v10 = vadd.s32 304, %v3086_v13  ;;  %vm4253_vm5 = vmand %vm981_vm14, %vm1046_vm0  ;;  %vm5513_vm14 = vnez %v5467_v50  ;;  %v5522_v51 = vmov 0  ;;  %v5524_v2 = vand.u32 4294901760, %v3983_v16 }
  0xbb   :  { %2778 = vmatpush.msk.msra.mxu1 %vm5496_vm8, %v5356_v21  ;;  %1878 = vmatpush.msra.mxu2 %v1701_v60  ;;  %v5347_v60 = vand.u32 4294901760, %v4172_v18  ;;  %v5503_v34 = vsel %vm4253_vm5, 4294967295, %v5502_v34  ;;  %v2680_v45 = vsel %vm4253_vm5, 1.0, %v5365_v48  ;;  %v5344_v32 = vand.u32 4294901760, %v4264_v9 }
  0xbc   :  { %2792 = vmatpush.msk.msra.mxu3 %vm5493_vm4, %v5356_v21  ;;  %1769 = vmatpush.msra.mxu0 %v3819_v47  ;;  %v4230_v47 = vsub.f32 %v4153_v63, %v5353_v25  ;;  %vm4236_vm4 = vmand %vm982_vm1, %vm1047_vm15  ;;  %vm1045_vm1 = vcmp.lt.s32.totalorder %v847_v17, %v3118_v29  ;;  %vm5509_vm5 = vcmp.lt.s32.totalorder %v846_v10, %v3118_v29  ;;  %v840_v50 = vadd.s32 256, %v3086_v13 }
  0xbd   :  { %1742 = vmatmul.f32.vlgmr.msrb.gmra.mxu3 %v4084_v23  ;;  %2779 = vmatpush.msk.msra.mxu1 %vm5499_vm7, %v5356_v21  ;;  %v5501_v52 = vsel %vm4236_vm4, 4294967295, %v5500_v52  ;;  %v4280_v42 = vsub.f32 %v4172_v18, %v5347_v60  ;;  %vm4303_vm0 = vmand %vm980_vm10, %vm1045_vm1  ;;  %v4339_v61 = vsub.f32 %v2680_v45, %v2680_v45  ;;  %vm5516_vm1 = vcmp.ge.s32.totalorder %v845_v30, %v3105_v24 }
  0xbe   :  { %1882 = vmatpush.msra.mxu2 %v1707_v59  ;;  %2793 = vmatpush.msk.msra.mxu3 %vm3846_vm13, %v5356_v21  ;;  %v844_v59 = vadd.s32 288, %v3086_v13  ;;  %vm5504_vm13 = vnez %v5462_v38  ;;  %v2679_v38 = vsel %vm4303_vm0, 1.0, %v5365_v48  ;;  %v525_v58 = vadd.f32 %v524_v0, %v495_v35  ;;  %v584_v35 = vpop.f32.mrf.mxu0 }
  0xbf   :  { %1772 = vmatpush.msra.mxu0 %v3843_v40  ;;  %2780 = vmatpush.msk.msra.mxu1 %vm5504_vm13, %v5356_v21  ;;  %v1995_v40 = vsub.f32 %v4170_v22, %v5348_v15  ;;  %v2013_v54 = vsub.f32 %v4264_v9, %v5344_v32  ;;  %v5551_v32 = vmov 0  ;;  %v5557_v60 = vmov 0 }
  0xc0   :  { %1886 = vmatpush.msra.mxu2 %v1713_v11  ;;  %2794 = vmatpush.msk.msra.mxu3 %vm5496_vm8, %v5356_v21  ;;  %v2681_v11 = vsel %vm4236_vm4, 1.0, %v5365_v48  ;;  %vm5505_vm8 = vnez %v5465_v8  ;;  %vm5510_vm4 = vcmp.ge.s32.totalorder %v846_v10, %v3105_v24  ;;  %v2002_v10 = vand.u32 4294901760, %v4280_v42 }
  0xc1   :  { %1775 = vmatpush.msra.mxu0 %v3864_v3  ;;  %2781 = vmatpush.msk.msra.mxu1 %vm5505_vm8, %v5356_v21  ;;  %v5508_v3 = vand.u32 4294901760, %v3936_v7  ;;  %vm4318_vm10 = vmand %vm5510_vm4, %vm5509_vm5  ;;  %v4329_v14 = vsub.f32 %v2681_v11, %v2681_v11  ;;  %vm1041_vm4 = vcmp.lt.s32.totalorder %v843_v28, %v3118_v29  ;;  %vm5515_vm5 = vcmp.lt.s32.totalorder %v845_v30, %v3118_v29  ;;  %v638_v1 = vpop.f32.mrf.mxu2 }
  0xc2   :  { %2795 = vmatpush.msk.msra.mxu3 %vm5499_vm7, %v5356_v21  ;;  %v5512_v27 = vsel %vm4318_vm10, 4294967295, %v5511_v27  ;;  %vm4345_vm15 = vmand %vm5516_vm1, %vm5515_vm5  ;;  %vm5519_vm7 = vnez %v5470_v57  ;;  %v2678_v37 = vsel %vm4318_vm10, 1.0, %v5365_v48  ;;  %vm5521_vm1 = vcmp.ge.s32.totalorder %v844_v59, %v3105_v24 }
  0xc3   :  { %1890 = vmatpush.msra.mxu2 %v5508_v3  ;;  %1778 = vmatpush.msra.mxu0 %v3888_v62  ;;  %v1990_v62 = vand.u32 4294901760, %v4230_v47  ;;  %v5518_v56 = vsel %vm4345_vm15, 4294967295, %v5517_v56  ;;  %v1996_v17 = vand.u32 4294901760, %v1995_v40  ;;  %v5526_v47 = vmov 0 }
  0xc4   :  { %2782 = vmatpush.msk.msra.mxu1 %vm5513_vm14, %v5356_v21  ;;  %2796 = vmatpush.msk.msra.mxu3 %vm5504_vm13, %v5356_v21  ;;  %vm5520_vm13 = vcmp.lt.s32.totalorder %v844_v59, %v3118_v29  ;;  %v841_v30 = vadd.s32 264, %v3086_v13  ;;  %v2008_v8 = vand.u32 4294901760, %v4285_v31  ;;  %v5342_v59 = vand.u32 4294901760, %v4294_v26 }
  0xc5   :  { %1894 = vmatpush.msra.mxu2 %v5514_v49  ;;  %1781 = vmatpush.msra.mxu0 %v3912_v33  ;;  %vm4363_vm5 = vmand %vm5521_vm1, %vm5520_vm13  ;;  %v842_v33 = vadd.s32 272, %v3086_v13  ;;  %vm5525_vm13 = vcmp.ge.s32.totalorder %v843_v28, %v3105_v24  ;;  %v5341_v36 = vand.u32 4294901760, %v4329_v14  ;;  %v551_v28 = vpop.f32.mrf.mxu3  ;;  %v5528_v40 = vand.u32 4294901760, %v4004_v12 }
  0xc6   :  { %2783 = vmatpush.msk.msra.mxu1 %vm5519_vm7, %v5356_v21  ;;  %v5523_v51 = vsel %vm4363_vm5, 4294967295, %v5522_v51  ;;  %2797 = vmatpush.msk.msra.mxu3 %vm5505_vm8, %v5356_v21  ;;  %vm4378_vm1 = vmand %vm5525_vm13, %vm1041_vm4  ;;  %v5337_v42 = vand.u32 4294901760, %v4339_v61  ;;  %v2677_v31 = vsel %vm4345_vm15, 1.0, %v5365_v48  ;;  %v2676_v11 = vsel %vm4363_vm5, 1.0, %v5365_v48 }
  0xc7   :  { %1898 = vmatpush.msra.mxu2 %v5524_v2  ;;  %v5527_v47 = vsel %vm4378_vm1, 4294967295, %v5526_v47  ;;  %1835 = vmatmul.f32.vlgmr.msra.gmra.mxu1 %v1638_v44  ;;  %v4395_v44 = vsub.f32 %v2679_v38, %v2679_v38  ;;  %v2675_v20 = vsel %vm4378_vm1, 1.0, %v5365_v48  ;;  %vm975_vm8 = vcmp.ge.s32.totalorder %v842_v33, %v3105_v24 }
  0xc8   :  { %1784 = vmatpush.msra.mxu0 %v3936_v7  ;;  %1991 = vmatpush.msrb.mxu1 %v1990_v62  ;;  %v4397_v7 = vsub.f32 %v2678_v37, %v2678_v37  ;;  %vm1040_vm4 = vcmp.lt.s32.totalorder %v842_v33, %v3118_v29  ;;  %v552_v45 = vadd.f32 %v551_v28, %v525_v58  ;;  %v2014_v0 = vand.u32 4294901760, %v2013_v54  ;;  %v609_v58 = vpop.f32.mrf.mxu1 }
  0xc9   :  { %1902 = vmatpush.msra.mxu2 %v5528_v40  ;;  %2798 = vmatpush.msk.msra.mxu3 %vm5513_vm14, %v5356_v21  ;;  %vm974_vm14 = vcmp.ge.s32.totalorder %v841_v30, %v3105_v24  ;;  %vm1039_vm13 = vcmp.lt.s32.totalorder %v841_v30, %v3118_v29  ;;  %v2019_v3 = vsub.f32 %v4294_v26, %v5342_v59  ;;  %v5336_v57 = vand.u32 4294901760, %v4395_v44  ;;  %v4472_v30 = vld [vmem:[%s5268_s2 + $0x8] sm:$0xff] }
  0xca   :  { %1904 = vmatmul.f32.vlgmr.msra.gmra.mxu2 %v4084_v23  ;;  %1997 = vmatpush.msrb.mxu1 %v1996_v17  ;;  %v2025_v49 = vsub.f32 %v4329_v14, %v5341_v36  ;;  %v5529_v62 = vmov 0  ;;  %v4448_v38 = vsub.f32 %v2677_v31, %v2677_v31  ;;  %v4450_v37 = vsub.f32 %v2676_v11, %v2676_v11 }
  0xcb   :  { %2089 = vmatpush.msrb.mxu2 %v4153_v63  ;;  %1787 = vmatpush.msra.mxu0 %v3960_v43  ;;  %v4432_v43 = vsub.f32 %v4339_v61, %v5337_v42  ;;  %v4452_v2 = vsub.f32 %v2675_v20, %v2675_v20  ;;  %v5532_v33 = vmov 0  ;;  %v585_v17 = vadd.f32 %v584_v35, %v552_v45 }
  0xcc   :  { %2799 = vmatpush.msk.msra.mxu3 %vm5519_vm7, %v5356_v21  ;;  %2003 = vmatpush.msrb.mxu1 %v2002_v10  ;;  %vm4439_vm7 = vmand %vm975_vm8, %vm1040_vm4  ;;  %vm973_vm4 = vcmp.ge.s32.totalorder %v840_v50, %v3105_v24  ;;  %vm1038_vm1 = vcmp.lt.s32.totalorder %v840_v50, %v3118_v29  ;;  %v2020_v10 = vand.u32 4294901760, %v2019_v3  ;;  %v2026_v54 = vand.u32 4294901760, %v2025_v49 }
  0xcd   :  { %1941 = vmatmul.f32.vlgmr.msra.gmra.mxu3 %v4084_v23  ;;  %v5530_v62 = vsel %vm4439_vm7, 4294967295, %v5529_v62  ;;  %2092 = vmatpush.msrb.mxu2 %v4170_v22  ;;  %v5335_v23 = vand.u32 4294901760, %v4397_v7  ;;  %5531 = vst [vmem:[#allocation6_spill] sm:$0xff] %v4452_v2  ;;  %vm4458_vm8 = vmand %vm974_vm14, %vm1039_vm13  ;;  %v2032_v28 = vand.u32 4294901760, %v4432_v43  ;;  %v2037_v40 = vsub.f32 %v4395_v44, %v5336_v57 }
  0xce   :  { %2816 = vmatpush.msk.msrb.mxu3 %vm4090_vm11, %v5356_v21  ;;  %v5533_v33 = vsel %vm4458_vm8, 4294967295, %v5532_v33  ;;  %1790 = vmatpush.msra.mxu0 %v3983_v16  ;;  %v2674_v16 = vsel %vm4439_vm7, 1.0, %v5365_v48  ;;  %v2673_v31 = vsel %vm4458_vm8, 1.0, %v5365_v48  ;;  %v5333_v11 = vand.u32 4294901760, %v4448_v38  ;;  %vm4498_vm14 = vmand %vm973_vm4, %vm1038_vm1 }
  0xcf   :  { %2009 = vmatpush.msrb.mxu1 %v2008_v8  ;;  %2095 = vmatpush.msrb.mxu2 %v4172_v18  ;;  %v871_v8 = vadd.s32 504, %v3086_v13  ;;  %v5325_v20 = vand.u32 4294901760, %v4450_v37  ;;  %v5329_v45 = vand.u32 4294901760, %v4452_v2  ;;  %v5534_v3 = vmov 0 }
  0xd0   :  { %2817 = vmatpush.msk.msrb.mxu3 %vm4101_vm3, %v5356_v21  ;;  %1793 = vmatpush.msra.mxu0 %v4004_v12  ;;  %v2043_v12 = vsub.f32 %v4397_v7, %v5335_v23  ;;  %v5535_v3 = vsel %vm4498_vm14, 4294967295, %v5534_v3  ;;  %v801_v35 = vunpack.c.l.bf16 %v4472_v30  ;;  %v870_v49 = vadd.s32 496, %v3086_v13 }
  0xd1   :  { %2015 = vmatpush.msrb.mxu1 %v2014_v0  ;;  %1796 = vmatmul.f32.vlgmr.msra.gmra.mxu0 %v4106_v53  ;;  %v610_v53 = vadd.f32 %v609_v58, %v585_v17  ;;  %v4509_v0 = vsub.f32 %v2674_v16, %v2674_v16  ;;  %v4513_v50 = vsub.f32 %v2673_v31, %v2673_v31  ;;  %v869_v43 = vadd.s32 488, %v3086_v13 }
  0xd2   :  { %2098 = vmatpush.msrb.mxu2 %v4179_v19  ;;  %2800 = vmatpush.msk.msrb.mxu0 %vm4090_vm11, %v5356_v21  ;;  %vm1004_vm1 = vcmp.ge.s32.totalorder %v871_v8, %v3105_v24  ;;  %vm1069_vm13 = vcmp.lt.s32.totalorder %v871_v8, %v3118_v29  ;;  %v2038_v17 = vand.u32 4294901760, %v2037_v40  ;;  %v2044_v58 = vand.u32 4294901760, %v2043_v12 }
  0xd3   :  { %2818 = vmatpush.msk.msrb.mxu3 %vm4112_vm9, %v5356_v21  ;;  %5536 = vst [vmem:[#allocation7_spill] sm:$0xff] %v4509_v0  ;;  %2021 = vmatpush.msrb.mxu1 %v2020_v10  ;;  %v2672_v10 = vsel %vm4498_vm14, 1.0, %v5365_v48  ;;  %v2049_v16 = vsub.f32 %v4448_v38, %v5333_v11  ;;  %v2055_v31 = vsub.f32 %v4450_v37, %v5325_v20  ;;  %v5340_v12 = vand.u32 4294901760, %v4509_v0  ;;  %vm4550_vm4 = vmand %vm1004_vm1, %vm1069_vm13 }
  0xd4   :  { %2101 = vmatpush.msrb.mxu2 %v4264_v9  ;;  %5537 = vst [vmem:[#allocation8_spill] sm:$0xff] %v4513_v50  ;;  %2801 = vmatpush.msk.msrb.mxu0 %vm4101_vm3, %v5356_v21  ;;  %v4537_v40 = vsub.f32 %v4452_v2, %v5329_v45  ;;  %v5538_v20 = vmov 0  ;;  %vm1003_vm14 = vcmp.ge.s32.totalorder %v870_v49, %v3105_v24  ;;  %v5338_v45 = vand.u32 4294901760, %v4513_v50 }
  0xd5   :  { %2819 = vmatpush.msk.msrb.mxu3 %vm4124_vm12, %v5356_v21  ;;  %2027 = vmatpush.msrb.mxu1 %v2026_v54  ;;  %v805_v54 = vmul.f32 %v801_v35, %v610_v53  ;;  %v5539_v20 = vsel %vm4550_vm4, 4294967295, %v5538_v20  ;;  %vm1068_vm3 = vcmp.lt.s32.totalorder %v870_v49, %v3118_v29  ;;  %v4558_v53 = vsub.f32 %v2672_v10, %v2672_v10 }
  0xd6   :  { %2104 = vmatpush.msrb.mxu2 %v4294_v26  ;;  %2802 = vmatpush.msk.msrb.mxu0 %vm4112_vm9, %v5356_v21  ;;  %vm1002_vm9 = vcmp.ge.s32.totalorder %v869_v43, %v3105_v24  ;;  %vm1067_vm8 = vcmp.lt.s32.totalorder %v869_v43, %v3118_v29  ;;  %v868_v8 = vadd.s32 480, %v3086_v13  ;;  %v2703_v35 = vsel %vm4550_vm4, 1.0, %v5365_v48  ;;  %vm4575_vm1 = vmand %vm1003_vm14, %vm1068_vm3 }
  0xd7   :  { %2820 = vmatpush.msk.msrb.mxu3 %vm4193_vm2, %v5356_v21  ;;  %2033 = vmatpush.msrb.mxu1 %v2032_v28  ;;  %5540 = vst [vmem:[#allocation9_spill] sm:$0xff] %v4558_v53  ;;  %v2050_v28 = vand.u32 4294901760, %v2049_v16  ;;  %v5541_v10 = vmov 0  ;;  %v867_v11 = vadd.s32 472, %v3086_v13  ;;  %vm5544_vm13 = vnez %v5501_v52 }
  0xd8   :  { %2107 = vmatpush.msrb.mxu2 %v4329_v14  ;;  %2803 = vmatpush.msk.msrb.mxu0 %vm4124_vm12, %v5356_v21  ;;  %v5542_v10 = vsel %vm4575_vm1, 4294967295, %v5541_v10  ;;  %v2062_v16 = vand.u32 4294901760, %v4537_v40  ;;  %vm4589_vm12 = vmand %vm1002_vm9, %vm1067_vm8  ;;  %v5545_v49 = vmov 0  ;;  %v866_v23 = vadd.s32 464, %v3086_v13 }
  0xd9   :  { %2821 = vmatpush.msk.msrb.mxu3 %vm4206_vm6, %v5356_v21  ;;  %2039 = vmatpush.msrb.mxu1 %v2038_v17  ;;  %5543 = vst [vmem:[#allocation10_spill] sm:$0xff] %v5542_v10  ;;  %v2056_v17 = vand.u32 4294901760, %v2055_v31  ;;  %v5546_v49 = vsel %vm4589_vm12, 4294967295, %v5545_v49  ;;  %v4595_v57 = vand.u32 4294901760, %v805_v54  ;;  %v2067_v42 = vsub.f32 %v4509_v0, %v5340_v12 }
  0xda   :  { %2110 = vmatpush.msrb.mxu2 %v4339_v61  ;;  %2804 = vmatpush.msk.msrb.mxu0 %vm4193_vm2, %v5356_v21  ;;  %v2073_v31 = vsub.f32 %v4513_v50, %v5338_v45  ;;  %v5345_v43 = vand.u32 4294901760, %v4558_v53  ;;  %vm5547_vm3 = vnez %v5503_v34  ;;  %v2702_v40 = vsel %vm4575_vm1, 1.0, %v5365_v48 }
  0xdb   :  { %2822 = vmatpush.msk.msrb.mxu3 %vm5544_vm13, %v5356_v21  ;;  %2045 = vmatpush.msrb.mxu1 %v2044_v58  ;;  %v4610_v58 = vsub.f32 %v2703_v35, %v2703_v35  ;;  %v2701_v45 = vsel %vm4589_vm12, 1.0, %v5365_v48  ;;  %v865_v35 = vadd.s32 456, %v3086_v13  ;;  %vm1064_vm8 = vcmp.lt.s32.totalorder %v866_v23, %v3118_v29 }
  0xdc   :  { %2113 = vmatpush.msrb.mxu2 %v4395_v44  ;;  %2805 = vmatpush.msk.msrb.mxu0 %vm4206_vm6, %v5356_v21  ;;  %v864_v12 = vadd.s32 448, %v3086_v13  ;;  %v2068_v36 = vand.u32 4294901760, %v2067_v42  ;;  %v2079_v59 = vsub.f32 %v4558_v53, %v5345_v43  ;;  %vm5549_vm14 = vcmp.lt.s32.totalorder %v868_v8, %v3118_v29 }
  0xdd   :  { %2823 = vmatpush.msk.msrb.mxu3 %vm5547_vm3, %v5356_v21  ;;  %5548 = vst [vmem:[#allocation11_spill] sm:$0xff] %v4610_v58  ;;  %2051 = vmatpush.msrb.mxu1 %v2050_v28  ;;  %v679_v28 = vpop.f32.mrf.mxu3  ;;  %vm5550_vm6 = vcmp.ge.s32.totalorder %v868_v8, %v3105_v24  ;;  %v4652_v42 = vsub.f32 %v805_v54, %v4595_v57  ;;  %v5354_v43 = vand.u32 4294901760, %v4610_v58  ;;  %v2074_v54 = vand.u32 4294901760, %v2073_v31 }
  0xde   :  { %2116 = vmatpush.msrb.mxu2 %v4397_v7  ;;  %2806 = vmatpush.msk.msrb.mxu0 %vm5544_vm13, %v5356_v21  ;;  %vm4641_vm13 = vmand %vm5550_vm6, %vm5549_vm14  ;;  %v4657_v8 = vsub.f32 %v2701_v45, %v2701_v45  ;;  %vm5555_vm6 = vcmp.lt.s32.totalorder %v867_v11, %v3118_v29  ;;  %vm5556_vm14 = vcmp.ge.s32.totalorder %v867_v11, %v3105_v24  ;;  %v863_v11 = vadd.s32 440, %v3086_v13 }
  0xdf   :  { %2824 = vmatpush.msk.msrb.mxu3 %vm4303_vm0, %v5356_v21  ;;  %2057 = vmatpush.msrb.mxu1 %v2056_v17  ;;  %v5552_v32 = vsel %vm4641_vm13, 4294967295, %v5551_v32  ;;  %v4654_v17 = vsub.f32 %v2702_v40, %v2702_v40  ;;  %vm4663_vm9 = vmand %vm5556_vm14, %vm5555_vm6  ;;  %v680_v15 = vadd.f32 %v679_v28, %v638_v1  ;;  %vm998_vm12 = vcmp.ge.s32.totalorder %v865_v35, %v3105_v24 }
  0xe0   :  { %2119 = vmatpush.msrb.mxu2 %v4448_v38  ;;  %2807 = vmatpush.msk.msrb.mxu0 %vm5547_vm3, %v5356_v21  ;;  %5554 = vst [vmem:[#allocation13_spill] sm:$0xff] %v4657_v8  ;;  %v5558_v60 = vsel %vm4663_vm9, 4294967295, %v5557_v60  ;;  %vm5559_vm3 = vcmp.ge.s32.totalorder %v866_v23, %v3105_v24  ;;  %vm1063_vm6 = vcmp.lt.s32.totalorder %v865_v35, %v3118_v29  ;;  %v2700_v1 = vsel %vm4641_vm13, 1.0, %v5365_v48  ;;  %v709_v23 = vpop.f32.mrf.mxu0 }
  0xe1   :  { %2825 = vmatpush.msk.msrb.mxu3 %vm4318_vm10, %v5356_v21  ;;  %5553 = vst [vmem:[#allocation12_spill] sm:$0xff] %v4654_v17  ;;  %2063 = vmatpush.msrb.mxu1 %v2062_v16  ;;  %vm4672_vm2 = vmand %vm5559_vm3, %vm1064_vm8  ;;  %vm997_vm3 = vcmp.ge.s32.totalorder %v864_v12, %v3105_v24  ;;  %vm1062_vm8 = vcmp.lt.s32.totalorder %v864_v12, %v3118_v29  ;;  %v2080_v16 = vand.u32 4294901760, %v2079_v59  ;;  %v2699_v31 = vsel %vm4663_vm9, 1.0, %v5365_v48 }
  0xe2   :  { %2122 = vmatpush.msrb.mxu2 %v4450_v37  ;;  %2808 = vmatpush.msk.msrb.mxu0 %vm4303_vm0, %v5356_v21  ;;  %v2698_v28 = vsel %vm4672_vm2, 1.0, %v5365_v48  ;;  %vm4712_vm14 = vmand %vm998_vm12, %vm1063_vm6  ;;  %v4717_v40 = vsub.f32 %v2700_v1, %v2700_v1  ;;  %v862_v35 = vadd.s32 432, %v3086_v13  ;;  %vm5566_vm12 = vnez %v5527_v47  ;;  %v736_v1 = vpop.f32.mrf.mxu1 }
  0xe3   :  { %2826 = vmatpush.msk.msrb.mxu3 %vm4345_vm15, %v5356_v21  ;;  %2069 = vmatpush.msrb.mxu1 %v2068_v36  ;;  %v2330_v36 = vsub.f32 %v4610_v58, %v5354_v43  ;;  %v710_v43 = vadd.f32 %v709_v23, %v680_v15  ;;  %vm996_vm6 = vcmp.ge.s32.totalorder %v863_v11, %v3105_v24  ;;  %v2697_v23 = vsel %vm4712_vm14, 1.0, %v5365_v48 }
  0xe4   :  { %2125 = vmatpush.msrb.mxu2 %v4452_v2  ;;  %2809 = vmatpush.msk.msrb.mxu0 %vm4318_vm10, %v5356_v21  ;;  %vm4723_vm10 = vmand %vm997_vm3, %vm1062_vm8  ;;  %vm1061_vm3 = vcmp.lt.s32.totalorder %v863_v11, %v3118_v29  ;;  %v4740_v12 = vsub.f32 %v2698_v28, %v2698_v28  ;;  %v5570_v15 = vand.u32 4294901760, %v4652_v42  ;;  %v5574_v41 = vand.u32 4294901760, %v4657_v8 }
  0xe5   :  { %2827 = vmatpush.msk.msrb.mxu3 %vm4363_vm5, %v5356_v21  ;;  %2075 = vmatpush.msrb.mxu1 %v2074_v54  ;;  %v4735_v54 = vsub.f32 %v2699_v31, %v2699_v31  ;;  %v2331_v31 = vand.u32 4294901760, %v2330_v36  ;;  %v2696_v58 = vsel %vm4723_vm10, 1.0, %v5365_v48  ;;  %v737_v2 = vadd.f32 %v736_v1, %v710_v43  ;;  %vm4769_vm8 = vmand %vm996_vm6, %vm1061_vm3  ;;  %v769_v48 = vpop.f32.mrf.mxu2  ;;  %v794_v10 = vpop.f32.mrf.mxu3 }
  0xe6   :  { %2128 = vmatpush.msrb.mxu2 %v4509_v0  ;;  %2810 = vmatpush.msk.msrb.mxu0 %vm4345_vm15, %v5356_v21  ;;  %5567 = vst [vmem:[#allocation14_spill] sm:$0xff] %v4740_v12  ;;  %v5568_v0 = vmov 1.0   ;;  %v2342_v43 = vsub.f32 %v4657_v8, %v5574_v41  ;;  %vm5575_vm6 = vnez %v5487_v39  ;;  %v859_v41 = vadd.s32 408, %v3086_v13 }
  0xe7   :  { %2828 = vmatpush.msk.msrb.mxu3 %vm5566_vm12, %v5356_v21  ;;  %2081 = vmatpush.msrb.mxu1 %v2080_v16  ;;  %v861_v21 = vadd.s32 424, %v3086_v13  ;;  %v5569_v16 = vand.u32 4294901760, %v4654_v17  ;;  %vm5576_vm15 = vnez %v5535_v3  ;;  %v4805_v1 = vsub.f32 %v2696_v58, %v2696_v58 }
  0xe8   :  { %2131 = vmatpush.msrb.mxu2 %v4513_v50  ;;  %2811 = vmatpush.msk.msrb.mxu0 %vm4363_vm5, %v5568_v0  ;;  %v1980_v50 = vsub.f32 %v4652_v42, %v5570_v15  ;;  %v860_v15 = vadd.s32 416, %v3086_v13  ;;  %v5577_v11 = vmov 0.0   ;;  %vm5579_vm3 = vcmp.ge.s32.totalorder %v862_v35, %v3105_v24 }
  0xe9   :  { %2829 = vmatpush.msk.msrb.mxu3 %vm4439_vm7, %v5568_v0  ;;  %v2336_v28 = vsub.f32 %v4654_v17, %v5569_v16  ;;  %2832 = vmatpush.msk.msra.mxu1 %vm4090_vm11, %v5568_v0  ;;  %vm5573_vm11 = vnez %v5533_v33  ;;  %v4787_v16 = vsub.f32 %v2697_v23, %v2697_v23  ;;  %v858_v58 = vadd.s32 400, %v3086_v13 }
  0xea   :  { %2134 = vmatpush.msrb.mxu2 %v4558_v53  ;;  %2812 = vmatpush.msk.msrb.mxu0 %vm5566_vm12, %v5568_v0  ;;  %v1981_v23 = vand.u32 4294901760, %v1980_v50  ;;  %v2695_v53 = vsel %vm4769_vm8, 1.0, %v5577_v11  ;;  %v770_v50 = vadd.f32 %v769_v48, %v737_v2  ;;  %v5584_v17 = vand.u32 4294901760, %v4735_v54 }
  0xeb   :  { %2830 = vmatpush.msk.msrb.mxu3 %vm5573_vm11, %v5568_v0  ;;  %2833 = vmatpush.msk.msra.mxu1 %vm5575_vm6, %v5568_v0  ;;  %v2337_v39 = vand.u32 4294901760, %v2336_v28  ;;  %vm5578_vm6 = vcmp.lt.s32.totalorder %v862_v35, %v3118_v29  ;;  %v2343_v35 = vand.u32 4294901760, %v2342_v43  ;;  %v5590_v43 = vand.u32 4294901760, %v4740_v12 }
  0xec   :  { %2848 = vmatpush.msk.msra.mxu2 %vm4550_vm4, %v5568_v0  ;;  %2813 = vmatpush.msk.msrb.mxu0 %vm4439_vm7, %v5568_v0  ;;  %vm4814_vm5 = vmand %vm5579_vm3, %vm5578_vm6  ;;  %vm5582_vm4 = vnez %v5489_v46  ;;  %v5583_v46 = vand.u32 4294901760, %v4717_v40  ;;  %v2354_v48 = vsub.f32 %v4735_v54, %v5584_v17  ;;  %vm5586_vm3 = vcmp.ge.s32.totalorder %v861_v21, %v3105_v24 }
  0xed   :  { %2831 = vmatpush.msk.msrb.mxu3 %vm5576_vm15, %v5568_v0  ;;  %2834 = vmatpush.msk.msra.mxu1 %vm5582_vm4, %v5568_v0  ;;  %vm5585_vm4 = vcmp.lt.s32.totalorder %v861_v21, %v3118_v29  ;;  %vm5589_vm7 = vnez %v5491_v6  ;;  %v4852_v17 = vsub.f32 %v4740_v12, %v5590_v43  ;;  %vm5591_vm12 = vnez %v5546_v49 }
  0xee   :  { %2849 = vmatpush.msk.msra.mxu2 %vm4575_vm1, %v5568_v0  ;;  %2814 = vmatpush.msk.msrb.mxu0 %vm5573_vm11, %v5568_v0  ;;  %v2348_v28 = vsub.f32 %v4717_v40, %v5583_v46  ;;  %vm4841_vm6 = vmand %vm5586_vm3, %vm5585_vm4  ;;  %v2694_v46 = vsel %vm4814_vm5, 1.0, %v5577_v11  ;;  %vm1057_vm3 = vcmp.lt.s32.totalorder %v859_v41, %v3118_v29  ;;  %v802_v21 = vunpack.c.h.bf16 %v4472_v30 }
  0xef   :  { %2332 = vmatpush.msra.mxu3 %v2331_v31  ;;  %2137 = vmatmul.f32.vlgmr.msrb.gmra.mxu2 %v4652_v42  ;;  %v4863_v6 = vsub.f32 %v2695_v53, %v2695_v53  ;;  %vm5593_vm1 = vcmp.ge.s32.totalorder %v860_v15, %v3105_v24  ;;  %v857_v12 = vadd.s32 392, %v3086_v13  ;;  %v5596_v30 = vand.u32 4294901760, %v4652_v42 }
  0xf0   :  { %2835 = vmatpush.msk.msra.mxu1 %vm5589_vm7, %v5568_v0  ;;  %2850 = vmatpush.msk.msra.mxu2 %vm5591_vm12, %v5568_v0  ;;  %vm5592_vm7 = vcmp.lt.s32.totalorder %v860_v15, %v3118_v29  ;;  %v795_v53 = vadd.f32 %v794_v10, %v770_v50  ;;  %vm991_vm4 = vcmp.ge.s32.totalorder %v858_v58, %v3105_v24  ;;  %v2349_v15 = vand.u32 4294901760, %v2348_v28 }
  0xf1   :  { %2338 = vmatpush.msra.mxu3 %v2337_v39  ;;  %vm4870_vm11 = vmand %vm5593_vm1, %vm5592_vm7  ;;  %2815 = vmatpush.msk.msrb.mxu0 %vm5576_vm15, %v5568_v0  ;;  %v2693_v39 = vsel %vm4841_vm6, 1.0, %v5577_v11  ;;  %vm1056_vm1 = vcmp.lt.s32.totalorder %v858_v58, %v3118_v29  ;;  %vm5597_vm7 = vnez %v5495_v4  ;;  %v4888_v43 = vsub.f32 %v2694_v46, %v2694_v46 }
  0xf2   :  { %2176 = vmatmul.f32.vlgmr.msrb.gmra.mxu3 %v5596_v30  ;;  %1982 = vmatmul.f32.vlgmr.msrb.gmra.mxu0 %v1981_v23  ;;  %vm5598_vm12 = vcmp.ge.s32.totalorder %v859_v41, %v3105_v24  ;;  %v856_v42 = vadd.s32 384, %v3086_v13  ;;  %v5601_v50 = vand.u32 4294901760, %v4153_v63  ;;  %v2355_v4 = vand.u32 4294901760, %v2354_v48 }
  0xf3   :  { %2836 = vmatpush.msk.msra.mxu1 %vm5597_vm7, %v5568_v0  ;;  %vm4894_vm15 = vmand %vm5598_vm12, %vm1057_vm3  ;;  %2851 = vmatpush.msk.msra.mxu2 %vm4641_vm13, %v5568_v0  ;;  %v5602_v23 = vand.u32 4294901760, %v4787_v16  ;;  %v2692_v41 = vsel %vm4870_vm11, 1.0, %v5577_v11  ;;  %v2377_v13 = vand.u32 4294901760, %v4863_v6  ;;  %v4912_v63 = vsub.f32 %v2693_v39, %v2693_v39 }
  0xf4   :  { %2183 = vmatpush.msra.mxu0 %v5601_v50  ;;  %2344 = vmatpush.msra.mxu3 %v2343_v35  ;;  %vm4918_vm12 = vmand %vm991_vm4, %vm1056_vm1  ;;  %vm990_vm3 = vcmp.ge.s32.totalorder %v857_v12, %v3105_v24  ;;  %vm1055_vm7 = vcmp.lt.s32.totalorder %v857_v12, %v3118_v29  ;;  %v5605_v35 = vand.u32 4294901760, %v4170_v22  ;;  %vm5606_vm13 = vnez %v5498_v55 }
  0xf5   :  { %v2366_v28 = vsub.f32 %v4787_v16, %v5602_v23  ;;  %2083 = vmatmul.f32.vlgmr.msrb.gmra.mxu1 %v4595_v57  ;;  %v2361_v46 = vand.u32 4294901760, %v4852_v17  ;;  %v806_v30 = vmul.f32 %v802_v21, %v795_v53  ;;  %v5607_v58 = vand.u32 4294901760, %v4805_v1  ;;  %2852 = vmatpush.msk.msra.mxu2 %vm4663_vm9, %v5568_v0  ;;  %vm4956_vm9 = vmand %vm990_vm3, %vm1055_vm7 }
  0xf6   :  { %2187 = vmatpush.msra.mxu0 %v5605_v35  ;;  %2837 = vmatpush.msk.msra.mxu1 %vm5606_vm13, %v5568_v0  ;;  %v2691_v50 = vsel %vm4894_vm15, 1.0, %v5577_v11  ;;  %v2383_v22 = vand.u32 4294901760, %v4888_v43  ;;  %v4940_v55 = vsub.f32 %v2692_v41, %v2692_v41  ;;  %vm989_vm13 = vcmp.ge.s32.totalorder %v856_v42, %v3105_v24 }
  0xf7   :  { %v2372_v39 = vsub.f32 %v4805_v1, %v5607_v58  ;;  %2350 = vmatpush.msra.mxu3 %v2349_v15  ;;  %vm1054_vm4 = vcmp.lt.s32.totalorder %v856_v42, %v3118_v29  ;;  %v5608_v17 = vand.u32 4294901760, %v4172_v18  ;;  %vm5609_vm1 = vnez %v5501_v52  ;;  %2853 = vmatpush.msk.msra.mxu2 %vm4672_vm2, %v5568_v0 }
  0xf8   :  { %2838 = vmatpush.msk.msra.mxu1 %vm5609_vm1, %v5568_v0  ;;  %v2690_v21 = vsel %vm4918_vm12, 1.0, %v5577_v11  ;;  %v2367_v18 = vand.u32 4294901760, %v2366_v28  ;;  %v2378_v52 = vsub.f32 %v4863_v6, %v2377_v13  ;;  %v2389_v15 = vand.u32 4294901760, %v4912_v63  ;;  %vm4980_vm7 = vmand %vm989_vm13, %vm1054_vm4 }
  0xf9   :  { %2191 = vmatpush.msra.mxu0 %v5608_v17  ;;  %2356 = vmatpush.msra.mxu3 %v2355_v4  ;;  %v4967_v23 = vsub.f32 %v2691_v50, %v2691_v50  ;;  %v5612_v12 = vand.u32 4294901760, %v4179_v19  ;;  %vm5613_vm3 = vnez %v5503_v34  ;;  %v4974_v41 = vand.u32 4294901760, %v806_v30 }
  0xfa   :  { %2839 = vmatpush.msk.msra.mxu1 %vm5613_vm3, %v5568_v0  ;;  %v2373_v35 = vand.u32 4294901760, %v2372_v39  ;;  %2854 = vmatpush.msk.msra.mxu2 %vm4712_vm14, %v5568_v0  ;;  %v2384_v19 = vsub.f32 %v4888_v43, %v2383_v22  ;;  %v2395_v34 = vand.u32 4294901760, %v4940_v55  ;;  %v4991_v28 = vsub.f32 %v2690_v21, %v2690_v21 }
  0xfb   :  { %2195 = vmatpush.msra.mxu0 %v5612_v12  ;;  %2362 = vmatpush.msra.mxu3 %v2361_v46  ;;  %v2689_v24 = vsel %vm4956_vm9, 1.0, %v5577_v11  ;;  %v5616_v29 = vand.u32 4294901760, %v4264_v9  ;;  %v2379_v42 = vand.u32 4294901760, %v2378_v52  ;;  %v2390_v46 = vsub.f32 %v4912_v63, %v2389_v15 }
  0xfc   :  { %2840 = vmatpush.msk.msra.mxu1 %vm4303_vm0, %v5568_v0  ;;  %2855 = vmatpush.msk.msra.mxu2 %vm4723_vm10, %v5568_v0  ;;  %v2401_v58 = vand.u32 4294901760, %v4967_v23  ;;  %v2688_v9 = vsel %vm4980_vm7, 1.0, %v5577_v11  ;;  %v5012_v39 = vsub.f32 %v806_v30, %v4974_v41  ;;  %vm5618_vm0 = vnez %v5512_v27 }
  0xfd   :  { %2199 = vmatpush.msra.mxu0 %v5616_v29  ;;  %2368 = vmatpush.msra.mxu3 %v2367_v18  ;;  %v5019_v50 = vsub.f32 %v2689_v24, %v2689_v24  ;;  %v2385_v17 = vand.u32 4294901760, %v2384_v19  ;;  %v2396_v30 = vsub.f32 %v4940_v55, %v2395_v34  ;;  %v2407_v21 = vand.u32 4294901760, %v4991_v28 }
  0xfe   :  { %2841 = vmatpush.msk.msra.mxu1 %vm5618_vm0, %v5568_v0  ;;  %2856 = vmatpush.msk.msra.mxu2 %vm4769_vm8, %v5568_v0  ;;  %v5619_v26 = vand.u32 4294901760, %v4329_v14  ;;  %vm5620_vm13 = vnez %v5518_v56  ;;  %v5033_v27 = vsub.f32 %v2688_v9, %v2688_v9  ;;  %v2391_v18 = vand.u32 4294901760, %v2390_v46 }
  0xff   :  { %2203 = vmatpush.msra.mxu0 %v5617_v5  ;;  %2374 = vmatpush.msra.mxu3 %v2373_v35  ;;  %v2402_v52 = vsub.f32 %v4967_v23, %v2401_v58  ;;  %v2320_v12 = vand.u32 4294901760, %v5012_v39  ;;  %v5621_v14 = vand.u32 4294901760, %v4339_v61  ;;  %vm5622_vm4 = vnez %v5523_v51 }
 0x100   :  { %2842 = vmatpush.msk.msra.mxu1 %vm5620_vm13, %v5568_v0  ;;  %2857 = vmatpush.msk.msra.mxu2 %vm4814_vm5, %v5568_v0  ;;  %v2413_v56 = vand.u32 4294901760, %v5019_v50  ;;  %v2397_v35 = vand.u32 4294901760, %v2396_v30  ;;  %v2408_v19 = vsub.f32 %v4991_v28, %v2407_v21  ;;  %v5623_v24 = vand.u32 4294901760, %v4395_v44 }
 0x101   :  { %2207 = vmatpush.msra.mxu0 %v5619_v26  ;;  %2380 = vmatpush.msra.mxu3 %v2379_v42  ;;  %vm5624_vm1 = vnez %v5527_v47  ;;  %v2419_v61 = vand.u32 4294901760, %v5033_v27  ;;  %v2403_v51 = vand.u32 4294901760, %v2402_v52  ;;  %v5625_v29 = vand.u32 4294901760, %v4397_v7  ;;  %v5638_v26 = vld [vmem:[#allocation7_spill] sm:$0xff]  ;;  %v5641_v52 = vld [vmem:[#allocation12_spill] sm:$0xff] }
 0x102   :  { %2843 = vmatpush.msk.msra.mxu1 %vm5622_vm4, %v5568_v0  ;;  %2858 = vmatpush.msk.msra.mxu2 %vm4841_vm6, %v5568_v0  ;;  %vm5626_vm3 = vnez %v5530_v62  ;;  %v2414_v47 = vsub.f32 %v5019_v50, %v2413_v56  ;;  %v2321_v44 = vsub.f32 %v5012_v39, %v2320_v12  ;;  %v2409_v42 = vand.u32 4294901760, %v2408_v19 }
 0x103   :  { %2211 = vmatpush.msra.mxu0 %v5621_v14  ;;  %2386 = vmatpush.msra.mxu3 %v2385_v17  ;;  %v5627_v7 = vand.u32 4294901760, %v4448_v38  ;;  %vm5628_vm0 = vnez %v5533_v33  ;;  %v2420_v62 = vsub.f32 %v5033_v27, %v2419_v61  ;;  %v5629_v46 = vand.u32 4294901760, %v4450_v37  ;;  %v5631_v33 = vld [vmem:[#allocation6_spill] sm:$0xff] }
 0x104   :  { %2844 = vmatpush.msk.msra.mxu1 %vm5624_vm1, %v5568_v0  ;;  %2859 = vmatpush.msk.msra.mxu2 %vm4870_vm11, %v5568_v0  ;;  %vm5630_vm13 = vnez %v5535_v3  ;;  %v2415_v38 = vand.u32 4294901760, %v2414_v47  ;;  %v2322_v9 = vand.u32 4294901760, %v2321_v44  ;;  %v5632_v5 = vand.u32 4294901760, %v5631_v33  ;;  %v5634_v37 = vld [vmem:[#allocation10_spill] sm:$0xff]  ;;  %v5636_v3 = vld [vmem:[#allocation11_spill] sm:$0xff] }
 0x105   :  { %2215 = vmatpush.msra.mxu0 %v5623_v24  ;;  %2392 = vmatpush.msra.mxu3 %v2391_v18  ;;  %v2421_v17 = vand.u32 4294901760, %v2420_v62  ;;  %vm5633_vm4 = vnez %v5539_v20  ;;  %vm5635_vm1 = vnez %v5634_v37  ;;  %v5637_v30 = vand.u32 4294901760, %v5636_v3  ;;  %v5646_v24 = vld [vmem:[#allocation13_spill] sm:$0xff] }
 0x106   :  { %2845 = vmatpush.msk.msra.mxu1 %vm5626_vm3, %v5568_v0  ;;  %2860 = vmatpush.msk.msra.mxu2 %vm4894_vm15, %v5568_v0  ;;  %v5639_v18 = vand.u32 4294901760, %v5638_v26  ;;  %vm5640_vm3 = vnez %v5546_v49  ;;  %v5642_v14 = vand.u32 4294901760, %v5641_v52  ;;  %v5651_v20 = vand.u32 4294901760, %v4717_v40 }
 0x107   :  { %2219 = vmatpush.msra.mxu0 %v5625_v29  ;;  %2398 = vmatpush.msra.mxu3 %v2397_v35  ;;  %v5643_v35 = vld [vmem:[#allocation8_spill] sm:$0xff]  ;;  %v5648_v29 = vld [vmem:[#allocation9_spill] sm:$0xff]  ;;  %v5652_v44 = vand.u32 4294901760, %v4735_v54 }
 0x108   :  { %2846 = vmatpush.msk.msra.mxu1 %vm5628_vm0, %v5568_v0  ;;  %2861 = vmatpush.msk.msra.mxu2 %vm4918_vm12, %v5568_v0  ;;  %v5644_v19 = vand.u32 4294901760, %v5643_v35  ;;  %vm5645_vm0 = vnez %v5552_v32  ;;  %v5649_v47 = vand.u32 4294901760, %v5648_v29  ;;  %v5655_v32 = vand.u32 4294901760, %v4787_v16 }
 0x109   :  { %2223 = vmatpush.msra.mxu0 %v5627_v7  ;;  %2404 = vmatpush.msra.mxu3 %v2403_v51  ;;  %v5647_v51 = vand.u32 4294901760, %v5646_v24 }
 0x10a   :  { %2847 = vmatpush.msk.msra.mxu1 %vm5630_vm13, %v5568_v0  ;;  %2862 = vmatpush.msk.msra.mxu2 %vm4956_vm9, %v5568_v0  ;;  %vm5650_vm13 = vnez %v5558_v60  ;;  %v5656_v60 = vand.u32 4294901760, %v4805_v1 }
 0x10b   :  { %2227 = vmatpush.msra.mxu0 %v5629_v46  ;;  %2410 = vmatpush.msra.mxu3 %v2409_v42 }
 0x10c   :  { %2282 = vmatmul.f32.vlgmr.msra.gmra.mxu1 %v4595_v57  ;;  %2863 = vmatpush.msk.msra.mxu2 %vm4980_vm7, %v5568_v0 }
 0x10d   :  { %2231 = vmatpush.msra.mxu0 %v5632_v5  ;;  %2864 = vmatpush.msk.msrb.mxu1 %vm5633_vm4, %v5568_v0 }
 0x10e   :  { %2416 = vmatpush.msra.mxu3 %v2415_v38  ;;  %2323 = vmatmul.f32.vlgmr.msra.gmra.mxu2 %v2322_v9 }
 0x10f   :  { %2865 = vmatpush.msk.msrb.mxu1 %vm5635_vm1, %v5568_v0  ;;  %2524 = vmatpush.msrb.mxu2 %v5637_v30 }
 0x110   :  { %2235 = vmatpush.msra.mxu0 %v5639_v18  ;;  %2422 = vmatpush.msra.mxu3 %v2421_v17 }
 0x111   :  { %2424 = vmatmul.f32.vlgmr.msra.gmra.mxu3 %v4974_v41  ;;  %2866 = vmatpush.msk.msrb.mxu1 %vm5640_vm3, %v5568_v0 }
 0x112   :  { %2528 = vmatpush.msrb.mxu2 %v5642_v14  ;;  %2880 = vmatpush.msk.msrb.mxu3 %vm5633_vm4, %v5568_v0 }
 0x113   :  { %2239 = vmatpush.msra.mxu0 %v5644_v19  ;;  %2867 = vmatpush.msk.msrb.mxu1 %vm5645_vm0, %v5568_v0 }
 0x114   :  { %2532 = vmatpush.msrb.mxu2 %v5647_v51  ;;  %2881 = vmatpush.msk.msrb.mxu3 %vm5635_vm1, %v5568_v0 }
 0x115   :  { %2243 = vmatpush.msra.mxu0 %v5649_v47  ;;  %2868 = vmatpush.msk.msrb.mxu1 %vm5650_vm13, %v5568_v0 }
 0x116   :  { %2245 = vmatmul.f32.vlgmr.msra.gmra.mxu0 %v4595_v57  ;;  %2536 = vmatpush.msrb.mxu2 %v5651_v20  ;;  %v5653_v57 = vld [vmem:[#allocation14_spill] sm:$0xff] }
 0x117   :  { %2430 = vmatpush.msrb.mxu0 %v5636_v3  ;;  %2882 = vmatpush.msk.msrb.mxu3 %vm5640_vm3, %v5568_v0  ;;  %v5654_v49 = vand.u32 4294901760, %v5653_v57 }
 0x118   :  { %2869 = vmatpush.msk.msrb.mxu1 %vm4672_vm2, %v5568_v0  ;;  %2540 = vmatpush.msrb.mxu2 %v5652_v44 }
 0x119   :  { %2433 = vmatpush.msrb.mxu0 %v5641_v52  ;;  %2883 = vmatpush.msk.msrb.mxu3 %vm5645_vm0, %v5568_v0 }
 0x11a   :  { %2870 = vmatpush.msk.msrb.mxu1 %vm4712_vm14, %v5568_v0  ;;  %2544 = vmatpush.msrb.mxu2 %v5654_v49 }
 0x11b   :  { %2436 = vmatpush.msrb.mxu0 %v5646_v24  ;;  %2884 = vmatpush.msk.msrb.mxu3 %vm5650_vm13, %v5568_v0 }
 0x11c   :  { %2871 = vmatpush.msk.msrb.mxu1 %vm4723_vm10, %v5568_v0  ;;  %2548 = vmatpush.msrb.mxu2 %v5655_v32 }
 0x11d   :  { %2439 = vmatpush.msrb.mxu0 %v4717_v40  ;;  %2885 = vmatpush.msk.msrb.mxu3 %vm4672_vm2, %v5568_v0  ;;  %vm34_vm2 = vcmask 130048  }
 0x11e   :  { %2872 = vmatpush.msk.msrb.mxu1 %vm4769_vm8, %v5568_v0  ;;  %2552 = vmatpush.msrb.mxu2 %v5656_v60  ;;  %35 = vst.msk [vmem:[#allocation2] sm:$0xff] %vm34_vm2, %v5577_v11 }
 0x11f   :  { %2442 = vmatpush.msrb.mxu0 %v4735_v54  ;;  %2886 = vmatpush.msk.msrb.mxu3 %vm4712_vm14, %v5568_v0 }
 0x120   :  { %2873 = vmatpush.msk.msrb.mxu1 %vm4814_vm5, %v5568_v0  ;;  %2556 = vmatpush.msrb.mxu2 %v2377_v13 }
 0x121   :  { %2445 = vmatpush.msrb.mxu0 %v5653_v57  ;;  %2887 = vmatpush.msk.msrb.mxu3 %vm4723_vm10, %v5568_v0  ;;  %v1402_v8 = vpop.f32.mrf.mxu1 }
 0x122   :  { %2874 = vmatpush.msk.msrb.mxu1 %vm4841_vm6, %v5568_v0  ;;  %2560 = vmatpush.msrb.mxu2 %v2383_v22 }
 0x123   :  { %2448 = vmatpush.msrb.mxu0 %v4787_v16  ;;  %2888 = vmatpush.msk.msrb.mxu3 %vm4769_vm8, %v5568_v0 }
 0x124   :  { %2875 = vmatpush.msk.msrb.mxu1 %vm4870_vm11, %v5568_v0  ;;  %2564 = vmatpush.msrb.mxu2 %v2389_v15 }
 0x125   :  { %2451 = vmatpush.msrb.mxu0 %v4805_v1  ;;  %2889 = vmatpush.msk.msrb.mxu3 %vm4814_vm5, %v5568_v0  ;;  %v1262_v37 = vld [vmem:[#allocation2] sm:$0xff] }
 0x126   :  { %2876 = vmatpush.msk.msrb.mxu1 %vm4894_vm15, %v5568_v0  ;;  %2568 = vmatpush.msrb.mxu2 %v2395_v34 }
 0x127   :  { %2454 = vmatpush.msrb.mxu0 %v4863_v6  ;;  %2890 = vmatpush.msk.msrb.mxu3 %vm4841_vm6, %v5568_v0 }
 0x128   :  { %2877 = vmatpush.msk.msrb.mxu1 %vm4918_vm12, %v5568_v0  ;;  %2572 = vmatpush.msrb.mxu2 %v2401_v58 }
 0x129   :  { %2457 = vmatpush.msrb.mxu0 %v4888_v43  ;;  %2891 = vmatpush.msk.msrb.mxu3 %vm4870_vm11, %v5568_v0  ;;  %v1301_v25 = vpop.f32.mrf.mxu0  ;;  %v1456_v40 = vpop.f32.mrf.mxu2 }
 0x12a   :  { %2878 = vmatpush.msk.msrb.mxu1 %vm4956_vm9, %v5568_v0  ;;  %2576 = vmatpush.msrb.mxu2 %v2407_v21  ;;  %v1403_v45 = vadd.f32 %v1402_v8, %v1301_v25  ;;  %v1601_v2 = vpop.f32.mrf.mxu1 }
 0x12b   :  { %2460 = vmatpush.msrb.mxu0 %v4912_v63  ;;  %2892 = vmatpush.msk.msrb.mxu3 %vm4894_vm15, %v5568_v0  ;;  %v1495_v54 = vpop.f32.mrf.mxu3 }
 0x12c   :  { %2879 = vmatpush.msk.msrb.mxu1 %vm4980_vm7, %v5568_v0  ;;  %2580 = vmatpush.msrb.mxu2 %v2413_v56  ;;  %v1457_v59 = vadd.f32 %v1456_v40, %v1403_v45 }
 0x12d   :  { %2463 = vmatpush.msrb.mxu0 %v4940_v55  ;;  %2893 = vmatpush.msk.msrb.mxu3 %vm4918_vm12, %v5568_v0 }
 0x12e   :  { %2517 = vmatmul.f32.vlgmr.msrb.gmra.mxu1 %v2320_v12  ;;  %2584 = vmatpush.msrb.mxu2 %v2419_v61  ;;  %v1496_v1 = vadd.f32 %v1495_v54, %v1457_v59 }
 0x12f   :  { %2466 = vmatpush.msrb.mxu0 %v4967_v23  ;;  %2894 = vmatpush.msk.msrb.mxu3 %vm4956_vm9, %v5568_v0 }
 0x130   :  { %2586 = vmatmul.f32.vlgmr.msrb.gmra.mxu2 %v4974_v41 }
 0x131   :  { %2469 = vmatpush.msrb.mxu0 %v4991_v28  ;;  %2895 = vmatpush.msk.msrb.mxu3 %vm4980_vm7, %v5568_v0 }
 0x132   :  { %2623 = vmatmul.f32.vlgmr.msrb.gmra.mxu3 %v4974_v41  ;;  %v1564_v36 = vpop.f32.mrf.mxu0 }
 0x133   :  { %2472 = vmatpush.msrb.mxu0 %v5019_v50  ;;  %v1565_v16 = vadd.f32 %v1564_v36, %v1496_v1 }
 0x135   :  { %2475 = vmatpush.msrb.mxu0 %v5033_v27  ;;  %v1602_v0 = vadd.f32 %v1601_v2, %v1565_v16 }
 0x136   :  { %2478 = vmatmul.f32.vlgmr.msrb.gmra.mxu0 %v5012_v39 }
 0x13d   :  { %v1642_v31 = vpop.f32.mrf.mxu2 }
 0x13e   :  { %v1643_v6 = vadd.f32 %v1642_v31, %v1602_v0 }
 0x140   :  { %v1743_v43 = vpop.f32.mrf.mxu3 }
 0x141   :  { %v1744_v13 = vadd.f32 %v1743_v43, %v1643_v6 }
 0x144   :  { %v1836_v48 = vpop.f32.mrf.mxu1 }
 0x14d   :  { %v1905_v55 = vpop.f32.mrf.mxu2 }
 0x14e   :  { %v1797_v10 = vpop.f32.mrf.mxu0 }
 0x14f   :  { %v1798_v63 = vadd.f32 %v1797_v10, %v1744_v13 }
 0x150   :  { %v1942_v15 = vpop.f32.mrf.mxu3 }
 0x151   :  { %v1837_v22 = vadd.f32 %v1836_v48, %v1798_v63 }
 0x153   :  { %v1906_v53 = vadd.f32 %v1905_v55, %v1837_v22 }
 0x155   :  { %v1943_v41 = vadd.f32 %v1942_v15, %v1906_v53 }
 0x16f   :  { %v1983_v23 = vpop.f32.mrf.mxu0 }
 0x170   :  { %v1984_v4 = vadd.f32 %v1983_v23, %v1943_v41 }
 0x172   :  { %v2084_v34 = vpop.f32.mrf.mxu1  ;;  %v2138_v58 = vpop.f32.mrf.mxu2 }
 0x173   :  { %v2085_v28 = vadd.f32 %v2084_v34, %v1984_v4 }
 0x175   :  { %v2139_v39 = vadd.f32 %v2138_v58, %v2085_v28  ;;  %v2177_v50 = vpop.f32.mrf.mxu3 }
 0x177   :  { %v2178_v27 = vadd.f32 %v2177_v50, %v2139_v39 }
 0x189   :  { %v2283_v56 = vpop.f32.mrf.mxu1 }
 0x191   :  { %v2324_v42 = vpop.f32.mrf.mxu2 }
 0x193   :  { %v2246_v21 = vpop.f32.mrf.mxu0 }
 0x194   :  { %v2247_v12 = vadd.f32 %v2246_v21, %v2178_v27  ;;  %v2425_v62 = vpop.f32.mrf.mxu3 }
 0x196   :  { %v2284_v61 = vadd.f32 %v2283_v56, %v2247_v12 }
 0x198   :  { %v2325_v7 = vadd.f32 %v2324_v42, %v2284_v61 }
 0x19a   :  { %v2426_v46 = vadd.f32 %v2425_v62, %v2325_v7 }
 0x1ab   :  { %v2518_v9 = vpop.f32.mrf.mxu1 }
 0x1b3   :  { %v2479_v38 = vpop.f32.mrf.mxu0  ;;  %v2587_v5 = vpop.f32.mrf.mxu2 }
 0x1b4   :  { %v2480_v11 = vadd.f32 %v2479_v38, %v2426_v46 }
 0x1b5   :  { %v2624_v3 = vpop.f32.mrf.mxu3 }
 0x1b6   :  { %v2519_v33 = vadd.f32 %v2518_v9, %v2480_v11 }
 0x1b8   :  { %v2588_v17 = vadd.f32 %v2587_v5, %v2519_v33 }
 0x1ba   :  { %v2625_v30 = vadd.f32 %v2624_v3, %v2588_v17 }
 0x1bc   :  { %v2627_v26 = vadd.f32 %v2625_v30, %v1262_v37 }
 0x1be   :  { %2629 = vst.msk [vmem:[#allocation2] sm:$0xff] %vm34_vm2, %v2627_v26 }
 0x1c5   :  { %v2633_v18 = vld [vmem:[#allocation2] sm:$0xff] }
 0x1c6   :  { %2634 = vst.msk [vmem:[%s5269_s3] sm:$0xff] %vm34_vm2, %v2633_v18 }
 0x1c7   :  { %2639 = vsyncpa [#allocation4], 1 }

</bundles_post_ra>
